<compile_context>
chip_gen: v7x
topology: tpu7x:2x2x1
jax: 0.10.0
libtpu: 0.0.40
codegen_flags: <defaults>
</compile_context>

<pallas_src>
import jax
import jax.numpy as jnp
from jax.experimental import pallas as pl
from jax.experimental.pallas import tpu as pltpu

# ---- problem sizes (small, consistent with the module) ----
B = 2        # batch
T = 8        # sequence length
BT = B * T
NHID = 32    # input_size
MHID = 128   # ConvDiscriminator mhid
NCLASS = 1   # nclass
KW = 5       # ResBlock conv kernel width
PAD = 2      # padding=2


def disc_kernel(x_ref, w0_ref, b0_ref, rbw_ref, rbb_ref, lwt_ref, lb_ref, out_ref):
    # ---- hoisted, loop-invariant constants (built once, reused by all 6 convs) ----
    # Tap-k reads source row r + d (d = k - PAD); valid only if it stays inside
    # the same batch element.  This mask also kills roll wrap-around, since the
    # wrap only happens at global boundaries, which are batch boundaries too.
    row = jax.lax.broadcasted_iota(jnp.int32, (BT, MHID), 0)
    tl = row % T                                          # local position in batch elem
    tap_masks = {}
    for k in range(KW):
        d = k - PAD
        if d != 0:
            tap_masks[k] = jnp.logical_and(tl + d >= 0, tl + d < T)

    x = x_ref[...]                                        # (BT, NHID) bf16 (cast in wrapper)

    # Conv1d(nhid, mhid, kernel=1)  ==  pointwise linear
    h = jnp.dot(x, w0_ref[...],
                preferred_element_type=jnp.float32) + b0_ref[...]   # (BT, MHID) f32

    def conv5(z, widx):
        """k=5, pad=2 conv: 5 rolled/masked (BT,MHID)x(MHID,MHID) bf16 matmuls."""
        zr = jnp.maximum(z, 0.0)                          # relu, f32
        # center tap (d == 0): no roll, no mask
        acc = jnp.dot(zr.astype(jnp.bfloat16), rbw_ref[widx * KW + PAD],
                      preferred_element_type=jnp.float32)
        for k in range(KW):
            d = k - PAD
            if d == 0:
                continue
            # rolled[r] = zr[(r + d) mod BT]; mask zeroes wrap / cross-batch rows.
            rolled = pltpu.roll(zr, shift=(-d) % BT, axis=0)
            tap = jnp.where(tap_masks[k], rolled, 0.0).astype(jnp.bfloat16)
            acc = acc + jnp.dot(tap, rbw_ref[widx * KW + k],
                                preferred_element_type=jnp.float32)
        return acc + rbb_ref[widx]                        # (BT, MHID) f32

    # 3x ResBlock(mhid): inputs + 0.3 * conv(relu(conv(relu(inputs))))
    for r in range(3):
        y = conv5(h, 2 * r)
        y = conv5(y, 2 * r + 1)
        h = h + 0.3 * y

    # ---- fused epilogue (level == 'sent'): mean over T, then Linear(MHID, NCLASS) ----
    pooled = jnp.concatenate(
        [jnp.mean(h[b * T:(b + 1) * T, :], axis=0, keepdims=True) for b in range(B)],
        axis=0)                                           # (B, MHID) f32, aligned slices
    # NCLASS == 1: do the tiny linear as multiply + lane reduce (avoids N=1 matmul).
    logits = jnp.sum(pooled * lwt_ref[...], axis=-1, keepdims=True) + lb_ref[...]
    out_ref[...] = logits                                 # (B, NCLASS) f32


@jax.jit
def adversarial_discriminator(x, w0, b0, rbw, rbb, lw, lb):
    """x: (B, T, NHID) f32 -> (B, NCLASS) f32 discriminator logits."""
    Bb, Tt, nhid = x.shape
    x2 = x.reshape(Bb * Tt, nhid).astype(jnp.bfloat16)
    w0b = w0.astype(jnp.bfloat16)
    # (6, KW, Cin, Cout) -> (6*KW, Cin, Cout); row widx*KW + k is conv widx, tap k.
    rbwb = rbw.reshape(6 * KW, MHID, MHID).astype(jnp.bfloat16)
    lwt = lw.T                                            # (NCLASS, MHID) = (1, 128)

    def full(a):
        return pl.BlockSpec(a.shape, lambda *_, n=a.ndim: (0,) * n)

    return pl.pallas_call(
        disc_kernel,
        out_shape=jax.ShapeDtypeStruct((Bb, NCLASS), jnp.float32),
        grid=(1,),                                        # single grid step
        in_specs=[full(x2), full(w0b), full(b0), full(rbwb), full(rbb),
                  full(lwt), full(lb)],
        out_specs=pl.BlockSpec((Bb, NCLASS), lambda *_: (0, 0)),
        compiler_params=pltpu.CompilerParams(
            dimension_semantics=("arbitrary",)),
    )(x2, w0b, b0, rbwb, rbb, lwt, lb)


def reference_forward(x, w0, b0, rbw, rbb, lw, lb):
    """Pure-JAX reference of the same math (same bf16 weight/activation casts)."""
    w0b = w0.astype(jnp.bfloat16)
    rbwb = rbw.astype(jnp.bfloat16)

    def conv5(z, w, bias):
        zb = jax.nn.relu(z).astype(jnp.bfloat16)
        zp = jnp.pad(zb, ((0, 0), (PAD, PAD), (0, 0)))
        acc = jnp.zeros((B, T, MHID), jnp.float32)
        for k in range(KW):
            acc = acc + jnp.einsum('btc,cd->btd', zp[:, k:k + T], w[k],
                                   preferred_element_type=jnp.float32)
        return acc + bias

    h = jnp.einsum('btc,cd->btd', x.astype(jnp.bfloat16), w0b,
                   preferred_element_type=jnp.float32) + b0
    for r in range(3):
        y = conv5(h, rbwb[2 * r], rbb[2 * r])
        y = conv5(y, rbwb[2 * r + 1], rbb[2 * r + 1])
        h = h + 0.3 * y
    pooled = jnp.mean(h, axis=1)
    return jnp.dot(pooled, lw, precision=jax.lax.Precision.HIGHEST) + lb[0]


if __name__ == "__main__":
    key = jax.random.PRNGKey(0)
    ks = jax.random.split(key, 8)

    # deterministic synthetic parameters
    x   = jax.random.normal(ks[0], (B, T, NHID), jnp.float32)
    w0  = jax.random.normal(ks[1], (NHID, MHID), jnp.float32) * 0.05   # Conv1d k=1
    b0  = jax.random.normal(ks[2], (1, MHID), jnp.float32) * 0.05
    # 3 ResBlocks x 2 convs each, stacked: (6, K, Cin, Cout) / (6, 1, Cout)
    rbw = jax.random.normal(ks[3], (6, KW, MHID, MHID), jnp.float32) * 0.05
    rbb = jax.random.normal(ks[4], (6, 1, MHID), jnp.float32) * 0.05
    lw  = jax.random.normal(ks[5], (MHID, NCLASS), jnp.float32) * 0.05  # Linear
    lb  = jax.random.normal(ks[6], (1, NCLASS), jnp.float32) * 0.05

    out = adversarial_discriminator(x, w0, b0, rbw, rbb, lw, lb)
    out = jax.block_until_ready(out)

    ref = reference_forward(x, w0, b0, rbw, rbb, lw, lb)
    assert out.shape == (B, NCLASS), out.shape
    assert jnp.allclose(out, ref, atol=2e-3, rtol=2e-3), (out, ref)

    print("KERNEL_OK")
</pallas_src>

<mosaic_0001>
module attributes {stable_mosaic.version = 11 : i64} {
  func.func @disc_kernel(%arg0: i32, %arg1: memref<16x32xbf16, #tpu.memory_space<vmem>>, %arg2: memref<32x128xbf16, #tpu.memory_space<vmem>>, %arg3: memref<1x128xf32, #tpu.memory_space<vmem>>, %arg4: memref<30x128x128xbf16, #tpu.memory_space<vmem>>, %arg5: memref<6x1x128xf32, #tpu.memory_space<vmem>>, %arg6: memref<1x128xf32, #tpu.memory_space<vmem>>, %arg7: memref<1x1xf32, #tpu.memory_space<vmem>>, %arg8: memref<2x1xf32, #tpu.memory_space<vmem>>) attributes {dimension_semantics = [#tpu.dimension_semantics<arbitrary>], iteration_bounds = array<i64: 1>, scalar_prefetch = 0 : i64, scratch_operands = 0 : i64, tpu.core_type = #tpu.core_type<tc>, window_params = [{pipeline_mode = #tpu.pipeline_mode<synchronous>, transform_indices = @transform_0, window_bounds = array<i64: 16, 32>}, {pipeline_mode = #tpu.pipeline_mode<synchronous>, transform_indices = @transform_1, window_bounds = array<i64: 32, 128>}, {pipeline_mode = #tpu.pipeline_mode<synchronous>, transform_indices = @transform_2, window_bounds = array<i64: 1, 128>}, {pipeline_mode = #tpu.pipeline_mode<synchronous>, transform_indices = @transform_3, window_bounds = array<i64: 30, 128, 128>}, {pipeline_mode = #tpu.pipeline_mode<synchronous>, transform_indices = @transform_4, window_bounds = array<i64: 6, 1, 128>}, {pipeline_mode = #tpu.pipeline_mode<synchronous>, transform_indices = @transform_5, window_bounds = array<i64: 1, 128>}, {pipeline_mode = #tpu.pipeline_mode<synchronous>, transform_indices = @transform_6, window_bounds = array<i64: 1, 1>}, {pipeline_mode = #tpu.pipeline_mode<synchronous>, transform_indices = @transform_7, window_bounds = array<i64: 2, 1>}]} {
    %0 = tpu.iota {dimensions = array<i32: 0>} : vector<16x128xi32>
    %c8_i32 = arith.constant 8 : i32
    %c0_i32 = arith.constant 0 : i32
    %1 = arith.cmpi eq, %c8_i32, %c0_i32 : i32
    %c1_i32 = arith.constant 1 : i32
    %2 = arith.select %1, %c1_i32, %c8_i32 : i32
    %3 = vector.broadcast %2 : i32 to vector<16x128xi32>
    %4 = arith.remsi %0, %3 : vector<16x128xi32>
    %c0_i32_0 = arith.constant 0 : i32
    %5 = vector.broadcast %c0_i32_0 : i32 to vector<16x128xi32>
    %6 = arith.cmpi ne, %4, %5 : vector<16x128xi32>
    %c0_i32_1 = arith.constant 0 : i32
    %7 = vector.broadcast %c0_i32_1 : i32 to vector<16x128xi32>
    %8 = arith.cmpi slt, %4, %7 : vector<16x128xi32>
    %c0_i32_2 = arith.constant 0 : i32
    %9 = arith.cmpi slt, %2, %c0_i32_2 : i32
    %10 = vector.broadcast %9 : i1 to vector<16x128xi1>
    %11 = vector.broadcast %10 : vector<16x128xi1> to vector<16x128xi1>
    %12 = arith.xori %8, %11 : vector<16x128xi1>
    %13 = arith.andi %12, %6 : vector<16x128xi1>
    %14 = vector.broadcast %2 : i32 to vector<16x128xi32>
    %15 = arith.addi %4, %14 : vector<16x128xi32>
    %16 = arith.select %13, %15, %4 : vector<16x128xi1>, vector<16x128xi32>
    %c-2_i32 = arith.constant -2 : i32
    %17 = vector.broadcast %c-2_i32 : i32 to vector<16x128xi32>
    %18 = arith.addi %16, %17 : vector<16x128xi32>
    %c0_i32_3 = arith.constant 0 : i32
    %19 = vector.broadcast %c0_i32_3 : i32 to vector<16x128xi32>
    %20 = arith.cmpi sge, %18, %19 : vector<16x128xi32>
    %c-2_i32_4 = arith.constant -2 : i32
    %21 = vector.broadcast %c-2_i32_4 : i32 to vector<16x128xi32>
    %22 = arith.addi %16, %21 : vector<16x128xi32>
    %c8_i32_5 = arith.constant 8 : i32
    %23 = vector.broadcast %c8_i32_5 : i32 to vector<16x128xi32>
    %24 = arith.cmpi slt, %22, %23 : vector<16x128xi32>
    %25 = arith.andi %20, %24 : vector<16x128xi1>
    %c-1_i32 = arith.constant -1 : i32
    %26 = vector.broadcast %c-1_i32 : i32 to vector<16x128xi32>
    %27 = arith.addi %16, %26 : vector<16x128xi32>
    %c0_i32_6 = arith.constant 0 : i32
    %28 = vector.broadcast %c0_i32_6 : i32 to vector<16x128xi32>
    %29 = arith.cmpi sge, %27, %28 : vector<16x128xi32>
    %c-1_i32_7 = arith.constant -1 : i32
    %30 = vector.broadcast %c-1_i32_7 : i32 to vector<16x128xi32>
    %31 = arith.addi %16, %30 : vector<16x128xi32>
    %c8_i32_8 = arith.constant 8 : i32
    %32 = vector.broadcast %c8_i32_8 : i32 to vector<16x128xi32>
    %33 = arith.cmpi slt, %31, %32 : vector<16x128xi32>
    %34 = arith.andi %29, %33 : vector<16x128xi1>
    %c1_i32_9 = arith.constant 1 : i32
    %35 = vector.broadcast %c1_i32_9 : i32 to vector<16x128xi32>
    %36 = arith.addi %16, %35 : vector<16x128xi32>
    %c0_i32_10 = arith.constant 0 : i32
    %37 = vector.broadcast %c0_i32_10 : i32 to vector<16x128xi32>
    %38 = arith.cmpi sge, %36, %37 : vector<16x128xi32>
    %c1_i32_11 = arith.constant 1 : i32
    %39 = vector.broadcast %c1_i32_11 : i32 to vector<16x128xi32>
    %40 = arith.addi %16, %39 : vector<16x128xi32>
    %c8_i32_12 = arith.constant 8 : i32
    %41 = vector.broadcast %c8_i32_12 : i32 to vector<16x128xi32>
    %42 = arith.cmpi slt, %40, %41 : vector<16x128xi32>
    %43 = arith.andi %38, %42 : vector<16x128xi1>
    %c2_i32 = arith.constant 2 : i32
    %44 = vector.broadcast %c2_i32 : i32 to vector<16x128xi32>
    %45 = arith.addi %16, %44 : vector<16x128xi32>
    %c0_i32_13 = arith.constant 0 : i32
    %46 = vector.broadcast %c0_i32_13 : i32 to vector<16x128xi32>
    %47 = arith.cmpi sge, %45, %46 : vector<16x128xi32>
    %c2_i32_14 = arith.constant 2 : i32
    %48 = vector.broadcast %c2_i32_14 : i32 to vector<16x128xi32>
    %49 = arith.addi %16, %48 : vector<16x128xi32>
    %c8_i32_15 = arith.constant 8 : i32
    %50 = vector.broadcast %c8_i32_15 : i32 to vector<16x128xi32>
    %51 = arith.cmpi slt, %49, %50 : vector<16x128xi32>
    %52 = arith.andi %47, %51 : vector<16x128xi1>
    %c0 = arith.constant 0 : index
    %c0_16 = arith.constant 0 : index
    %53 = vector.load %arg1[%c0, %c0_16] : memref<16x32xbf16, #tpu.memory_space<vmem>>, vector<16x32xbf16>
    %c0_17 = arith.constant 0 : index
    %c0_18 = arith.constant 0 : index
    %54 = vector.load %arg2[%c0_17, %c0_18] : memref<32x128xbf16, #tpu.memory_space<vmem>>, vector<32x128xbf16>
    %cst = arith.constant dense<0.000000e+00> : vector<16x128xf32>
    %55 = tpu.matmul %53, %54, %cst {dimension_numbers = #tpu.dot_dimension_numbers<[1], [0], [0], [1], [0, 0, 1, 1], [], []>} : vector<16x32xbf16>, vector<32x128xbf16>, vector<16x128xf32> -> vector<16x128xf32>
    %c0_19 = arith.constant 0 : index
    %c0_20 = arith.constant 0 : index
    %56 = vector.load %arg3[%c0_19, %c0_20] : memref<1x128xf32, #tpu.memory_space<vmem>>, vector<1x128xf32>
    %57 = vector.broadcast %56 : vector<1x128xf32> to vector<16x128xf32>
    %58 = arith.addf %55, %57 : vector<16x128xf32>
    %cst_21 = arith.constant 0.000000e+00 : f32
    %59 = vector.broadcast %cst_21 : f32 to vector<16x128xf32>
    %60 = arith.maximumf %58, %59 : vector<16x128xf32>
    %61 = arith.truncf %60 : vector<16x128xf32> to vector<16x128xbf16>
    %c2 = arith.constant 2 : index
    %c0_22 = arith.constant 0 : index
    %c0_23 = arith.constant 0 : index
    %62 = vector.load %arg4[%c2, %c0_22, %c0_23] : memref<30x128x128xbf16, #tpu.memory_space<vmem>>, vector<1x128x128xbf16>
    %63 = vector.shape_cast %62 : vector<1x128x128xbf16> to vector<128x128xbf16>
    %cst_24 = arith.constant dense<0.000000e+00> : vector<16x128xf32>
    %64 = tpu.matmul %61, %63, %cst_24 {dimension_numbers = #tpu.dot_dimension_numbers<[1], [0], [0], [1], [0, 0, 1, 1], [], []>} : vector<16x128xbf16>, vector<128x128xbf16>, vector<16x128xf32> -> vector<16x128xf32>
    %c2_i32_25 = arith.constant 2 : i32
    %65 = tpu.dynamic_rotate %60 by %c2_i32_25 dim 0 : vector<16x128xf32>, i32 -> vector<16x128xf32>
    %cst_26 = arith.constant 0.000000e+00 : f32
    %66 = vector.broadcast %cst_26 : f32 to vector<16x128xf32>
    %67 = arith.select %25, %65, %66 : vector<16x128xi1>, vector<16x128xf32>
    %68 = arith.truncf %67 : vector<16x128xf32> to vector<16x128xbf16>
    %c0_27 = arith.constant 0 : index
    %c0_28 = arith.constant 0 : index
    %c0_29 = arith.constant 0 : index
    %69 = vector.load %arg4[%c0_27, %c0_28, %c0_29] : memref<30x128x128xbf16, #tpu.memory_space<vmem>>, vector<1x128x128xbf16>
    %70 = vector.shape_cast %69 : vector<1x128x128xbf16> to vector<128x128xbf16>
    %cst_30 = arith.constant dense<0.000000e+00> : vector<16x128xf32>
    %71 = tpu.matmul %68, %70, %cst_30 {dimension_numbers = #tpu.dot_dimension_numbers<[1], [0], [0], [1], [0, 0, 1, 1], [], []>} : vector<16x128xbf16>, vector<128x128xbf16>, vector<16x128xf32> -> vector<16x128xf32>
    %72 = arith.addf %64, %71 : vector<16x128xf32>
    %c1_i32_31 = arith.constant 1 : i32
    %73 = tpu.dynamic_rotate %60 by %c1_i32_31 dim 0 : vector<16x128xf32>, i32 -> vector<16x128xf32>
    %cst_32 = arith.constant 0.000000e+00 : f32
    %74 = vector.broadcast %cst_32 : f32 to vector<16x128xf32>
    %75 = arith.select %34, %73, %74 : vector<16x128xi1>, vector<16x128xf32>
    %76 = arith.truncf %75 : vector<16x128xf32> to vector<16x128xbf16>
    %c1 = arith.constant 1 : index
    %c0_33 = arith.constant 0 : index
    %c0_34 = arith.constant 0 : index
    %77 = vector.load %arg4[%c1, %c0_33, %c0_34] : memref<30x128x128xbf16, #tpu.memory_space<vmem>>, vector<1x128x128xbf16>
    %78 = vector.shape_cast %77 : vector<1x128x128xbf16> to vector<128x128xbf16>
    %cst_35 = arith.constant dense<0.000000e+00> : vector<16x128xf32>
    %79 = tpu.matmul %76, %78, %cst_35 {dimension_numbers = #tpu.dot_dimension_numbers<[1], [0], [0], [1], [0, 0, 1, 1], [], []>} : vector<16x128xbf16>, vector<128x128xbf16>, vector<16x128xf32> -> vector<16x128xf32>
    %80 = arith.addf %72, %79 : vector<16x128xf32>
    %c15_i32 = arith.constant 15 : i32
    %81 = tpu.dynamic_rotate %60 by %c15_i32 dim 0 : vector<16x128xf32>, i32 -> vector<16x128xf32>
    %cst_36 = arith.constant 0.000000e+00 : f32
    %82 = vector.broadcast %cst_36 : f32 to vector<16x128xf32>
    %83 = arith.select %43, %81, %82 : vector<16x128xi1>, vector<16x128xf32>
    %84 = arith.truncf %83 : vector<16x128xf32> to vector<16x128xbf16>
    %c3 = arith.constant 3 : index
    %c0_37 = arith.constant 0 : index
    %c0_38 = arith.constant 0 : index
    %85 = vector.load %arg4[%c3, %c0_37, %c0_38] : memref<30x128x128xbf16, #tpu.memory_space<vmem>>, vector<1x128x128xbf16>
    %86 = vector.shape_cast %85 : vector<1x128x128xbf16> to vector<128x128xbf16>
    %cst_39 = arith.constant dense<0.000000e+00> : vector<16x128xf32>
    %87 = tpu.matmul %84, %86, %cst_39 {dimension_numbers = #tpu.dot_dimension_numbers<[1], [0], [0], [1], [0, 0, 1, 1], [], []>} : vector<16x128xbf16>, vector<128x128xbf16>, vector<16x128xf32> -> vector<16x128xf32>
    %88 = arith.addf %80, %87 : vector<16x128xf32>
    %c14_i32 = arith.constant 14 : i32
    %89 = tpu.dynamic_rotate %60 by %c14_i32 dim 0 : vector<16x128xf32>, i32 -> vector<16x128xf32>
    %cst_40 = arith.constant 0.000000e+00 : f32
    %90 = vector.broadcast %cst_40 : f32 to vector<16x128xf32>
    %91 = arith.select %52, %89, %90 : vector<16x128xi1>, vector<16x128xf32>
    %92 = arith.truncf %91 : vector<16x128xf32> to vector<16x128xbf16>
    %c4 = arith.constant 4 : index
    %c0_41 = arith.constant 0 : index
    %c0_42 = arith.constant 0 : index
    %93 = vector.load %arg4[%c4, %c0_41, %c0_42] : memref<30x128x128xbf16, #tpu.memory_space<vmem>>, vector<1x128x128xbf16>
    %94 = vector.shape_cast %93 : vector<1x128x128xbf16> to vector<128x128xbf16>
    %cst_43 = arith.constant dense<0.000000e+00> : vector<16x128xf32>
    %95 = tpu.matmul %92, %94, %cst_43 {dimension_numbers = #tpu.dot_dimension_numbers<[1], [0], [0], [1], [0, 0, 1, 1], [], []>} : vector<16x128xbf16>, vector<128x128xbf16>, vector<16x128xf32> -> vector<16x128xf32>
    %96 = arith.addf %88, %95 : vector<16x128xf32>
    %c0_44 = arith.constant 0 : index
    %c0_45 = arith.constant 0 : index
    %c0_46 = arith.constant 0 : index
    %97 = vector.load %arg5[%c0_44, %c0_45, %c0_46] : memref<6x1x128xf32, #tpu.memory_space<vmem>>, vector<1x1x128xf32>
    %98 = vector.shape_cast %97 : vector<1x1x128xf32> to vector<1x128xf32>
    %99 = vector.broadcast %98 : vector<1x128xf32> to vector<16x128xf32>
    %100 = arith.addf %96, %99 : vector<16x128xf32>
    %cst_47 = arith.constant 0.000000e+00 : f32
    %101 = vector.broadcast %cst_47 : f32 to vector<16x128xf32>
    %102 = arith.maximumf %100, %101 : vector<16x128xf32>
    %103 = arith.truncf %102 : vector<16x128xf32> to vector<16x128xbf16>
    %c7 = arith.constant 7 : index
    %c0_48 = arith.constant 0 : index
    %c0_49 = arith.constant 0 : index
    %104 = vector.load %arg4[%c7, %c0_48, %c0_49] : memref<30x128x128xbf16, #tpu.memory_space<vmem>>, vector<1x128x128xbf16>
    %105 = vector.shape_cast %104 : vector<1x128x128xbf16> to vector<128x128xbf16>
    %cst_50 = arith.constant dense<0.000000e+00> : vector<16x128xf32>
    %106 = tpu.matmul %103, %105, %cst_50 {dimension_numbers = #tpu.dot_dimension_numbers<[1], [0], [0], [1], [0, 0, 1, 1], [], []>} : vector<16x128xbf16>, vector<128x128xbf16>, vector<16x128xf32> -> vector<16x128xf32>
    %c2_i32_51 = arith.constant 2 : i32
    %107 = tpu.dynamic_rotate %102 by %c2_i32_51 dim 0 : vector<16x128xf32>, i32 -> vector<16x128xf32>
    %cst_52 = arith.constant 0.000000e+00 : f32
    %108 = vector.broadcast %cst_52 : f32 to vector<16x128xf32>
    %109 = arith.select %25, %107, %108 : vector<16x128xi1>, vector<16x128xf32>
    %110 = arith.truncf %109 : vector<16x128xf32> to vector<16x128xbf16>
    %c5 = arith.constant 5 : index
    %c0_53 = arith.constant 0 : index
    %c0_54 = arith.constant 0 : index
    %111 = vector.load %arg4[%c5, %c0_53, %c0_54] : memref<30x128x128xbf16, #tpu.memory_space<vmem>>, vector<1x128x128xbf16>
    %112 = vector.shape_cast %111 : vector<1x128x128xbf16> to vector<128x128xbf16>
    %cst_55 = arith.constant dense<0.000000e+00> : vector<16x128xf32>
    %113 = tpu.matmul %110, %112, %cst_55 {dimension_numbers = #tpu.dot_dimension_numbers<[1], [0], [0], [1], [0, 0, 1, 1], [], []>} : vector<16x128xbf16>, vector<128x128xbf16>, vector<16x128xf32> -> vector<16x128xf32>
    %114 = arith.addf %106, %113 : vector<16x128xf32>
    %c1_i32_56 = arith.constant 1 : i32
    %115 = tpu.dynamic_rotate %102 by %c1_i32_56 dim 0 : vector<16x128xf32>, i32 -> vector<16x128xf32>
    %cst_57 = arith.constant 0.000000e+00 : f32
    %116 = vector.broadcast %cst_57 : f32 to vector<16x128xf32>
    %117 = arith.select %34, %115, %116 : vector<16x128xi1>, vector<16x128xf32>
    %118 = arith.truncf %117 : vector<16x128xf32> to vector<16x128xbf16>
    %c6 = arith.constant 6 : index
    %c0_58 = arith.constant 0 : index
    %c0_59 = arith.constant 0 : index
    %119 = vector.load %arg4[%c6, %c0_58, %c0_59] : memref<30x128x128xbf16, #tpu.memory_space<vmem>>, vector<1x128x128xbf16>
    %120 = vector.shape_cast %119 : vector<1x128x128xbf16> to vector<128x128xbf16>
    %cst_60 = arith.constant dense<0.000000e+00> : vector<16x128xf32>
    %121 = tpu.matmul %118, %120, %cst_60 {dimension_numbers = #tpu.dot_dimension_numbers<[1], [0], [0], [1], [0, 0, 1, 1], [], []>} : vector<16x128xbf16>, vector<128x128xbf16>, vector<16x128xf32> -> vector<16x128xf32>
    %122 = arith.addf %114, %121 : vector<16x128xf32>
    %c15_i32_61 = arith.constant 15 : i32
    %123 = tpu.dynamic_rotate %102 by %c15_i32_61 dim 0 : vector<16x128xf32>, i32 -> vector<16x128xf32>
    %cst_62 = arith.constant 0.000000e+00 : f32
    %124 = vector.broadcast %cst_62 : f32 to vector<16x128xf32>
    %125 = arith.select %43, %123, %124 : vector<16x128xi1>, vector<16x128xf32>
    %126 = arith.truncf %125 : vector<16x128xf32> to vector<16x128xbf16>
    %c8 = arith.constant 8 : index
    %c0_63 = arith.constant 0 : index
    %c0_64 = arith.constant 0 : index
    %127 = vector.load %arg4[%c8, %c0_63, %c0_64] : memref<30x128x128xbf16, #tpu.memory_space<vmem>>, vector<1x128x128xbf16>
    %128 = vector.shape_cast %127 : vector<1x128x128xbf16> to vector<128x128xbf16>
    %cst_65 = arith.constant dense<0.000000e+00> : vector<16x128xf32>
    %129 = tpu.matmul %126, %128, %cst_65 {dimension_numbers = #tpu.dot_dimension_numbers<[1], [0], [0], [1], [0, 0, 1, 1], [], []>} : vector<16x128xbf16>, vector<128x128xbf16>, vector<16x128xf32> -> vector<16x128xf32>
    %130 = arith.addf %122, %129 : vector<16x128xf32>
    %c14_i32_66 = arith.constant 14 : i32
    %131 = tpu.dynamic_rotate %102 by %c14_i32_66 dim 0 : vector<16x128xf32>, i32 -> vector<16x128xf32>
    %cst_67 = arith.constant 0.000000e+00 : f32
    %132 = vector.broadcast %cst_67 : f32 to vector<16x128xf32>
    %133 = arith.select %52, %131, %132 : vector<16x128xi1>, vector<16x128xf32>
    %134 = arith.truncf %133 : vector<16x128xf32> to vector<16x128xbf16>
    %c9 = arith.constant 9 : index
    %c0_68 = arith.constant 0 : index
    %c0_69 = arith.constant 0 : index
    %135 = vector.load %arg4[%c9, %c0_68, %c0_69] : memref<30x128x128xbf16, #tpu.memory_space<vmem>>, vector<1x128x128xbf16>
    %136 = vector.shape_cast %135 : vector<1x128x128xbf16> to vector<128x128xbf16>
    %cst_70 = arith.constant dense<0.000000e+00> : vector<16x128xf32>
    %137 = tpu.matmul %134, %136, %cst_70 {dimension_numbers = #tpu.dot_dimension_numbers<[1], [0], [0], [1], [0, 0, 1, 1], [], []>} : vector<16x128xbf16>, vector<128x128xbf16>, vector<16x128xf32> -> vector<16x128xf32>
    %138 = arith.addf %130, %137 : vector<16x128xf32>
    %c1_71 = arith.constant 1 : index
    %c0_72 = arith.constant 0 : index
    %c0_73 = arith.constant 0 : index
    %139 = vector.load %arg5[%c1_71, %c0_72, %c0_73] : memref<6x1x128xf32, #tpu.memory_space<vmem>>, vector<1x1x128xf32>
    %140 = vector.shape_cast %139 : vector<1x1x128xf32> to vector<1x128xf32>
    %141 = vector.broadcast %140 : vector<1x128xf32> to vector<16x128xf32>
    %142 = arith.addf %138, %141 : vector<16x128xf32>
    %cst_74 = arith.constant 3.000000e-01 : f32
    %143 = vector.broadcast %cst_74 : f32 to vector<16x128xf32>
    %144 = arith.mulf %143, %142 : vector<16x128xf32>
    %145 = arith.addf %58, %144 : vector<16x128xf32>
    %cst_75 = arith.constant 0.000000e+00 : f32
    %146 = vector.broadcast %cst_75 : f32 to vector<16x128xf32>
    %147 = arith.maximumf %145, %146 : vector<16x128xf32>
    %148 = arith.truncf %147 : vector<16x128xf32> to vector<16x128xbf16>
    %c12 = arith.constant 12 : index
    %c0_76 = arith.constant 0 : index
    %c0_77 = arith.constant 0 : index
    %149 = vector.load %arg4[%c12, %c0_76, %c0_77] : memref<30x128x128xbf16, #tpu.memory_space<vmem>>, vector<1x128x128xbf16>
    %150 = vector.shape_cast %149 : vector<1x128x128xbf16> to vector<128x128xbf16>
    %cst_78 = arith.constant dense<0.000000e+00> : vector<16x128xf32>
    %151 = tpu.matmul %148, %150, %cst_78 {dimension_numbers = #tpu.dot_dimension_numbers<[1], [0], [0], [1], [0, 0, 1, 1], [], []>} : vector<16x128xbf16>, vector<128x128xbf16>, vector<16x128xf32> -> vector<16x128xf32>
    %c2_i32_79 = arith.constant 2 : i32
    %152 = tpu.dynamic_rotate %147 by %c2_i32_79 dim 0 : vector<16x128xf32>, i32 -> vector<16x128xf32>
    %cst_80 = arith.constant 0.000000e+00 : f32
    %153 = vector.broadcast %cst_80 : f32 to vector<16x128xf32>
    %154 = arith.select %25, %152, %153 : vector<16x128xi1>, vector<16x128xf32>
    %155 = arith.truncf %154 : vector<16x128xf32> to vector<16x128xbf16>
    %c10 = arith.constant 10 : index
    %c0_81 = arith.constant 0 : index
    %c0_82 = arith.constant 0 : index
    %156 = vector.load %arg4[%c10, %c0_81, %c0_82] : memref<30x128x128xbf16, #tpu.memory_space<vmem>>, vector<1x128x128xbf16>
    %157 = vector.shape_cast %156 : vector<1x128x128xbf16> to vector<128x128xbf16>
    %cst_83 = arith.constant dense<0.000000e+00> : vector<16x128xf32>
    %158 = tpu.matmul %155, %157, %cst_83 {dimension_numbers = #tpu.dot_dimension_numbers<[1], [0], [0], [1], [0, 0, 1, 1], [], []>} : vector<16x128xbf16>, vector<128x128xbf16>, vector<16x128xf32> -> vector<16x128xf32>
    %159 = arith.addf %151, %158 : vector<16x128xf32>
    %c1_i32_84 = arith.constant 1 : i32
    %160 = tpu.dynamic_rotate %147 by %c1_i32_84 dim 0 : vector<16x128xf32>, i32 -> vector<16x128xf32>
    %cst_85 = arith.constant 0.000000e+00 : f32
    %161 = vector.broadcast %cst_85 : f32 to vector<16x128xf32>
    %162 = arith.select %34, %160, %161 : vector<16x128xi1>, vector<16x128xf32>
    %163 = arith.truncf %162 : vector<16x128xf32> to vector<16x128xbf16>
    %c11 = arith.constant 11 : index
    %c0_86 = arith.constant 0 : index
    %c0_87 = arith.constant 0 : index
    %164 = vector.load %arg4[%c11, %c0_86, %c0_87] : memref<30x128x128xbf16, #tpu.memory_space<vmem>>, vector<1x128x128xbf16>
    %165 = vector.shape_cast %164 : vector<1x128x128xbf16> to vector<128x128xbf16>
    %cst_88 = arith.constant dense<0.000000e+00> : vector<16x128xf32>
    %166 = tpu.matmul %163, %165, %cst_88 {dimension_numbers = #tpu.dot_dimension_numbers<[1], [0], [0], [1], [0, 0, 1, 1], [], []>} : vector<16x128xbf16>, vector<128x128xbf16>, vector<16x128xf32> -> vector<16x128xf32>
    %167 = arith.addf %159, %166 : vector<16x128xf32>
    %c15_i32_89 = arith.constant 15 : i32
    %168 = tpu.dynamic_rotate %147 by %c15_i32_89 dim 0 : vector<16x128xf32>, i32 -> vector<16x128xf32>
    %cst_90 = arith.constant 0.000000e+00 : f32
    %169 = vector.broadcast %cst_90 : f32 to vector<16x128xf32>
    %170 = arith.select %43, %168, %169 : vector<16x128xi1>, vector<16x128xf32>
    %171 = arith.truncf %170 : vector<16x128xf32> to vector<16x128xbf16>
    %c13 = arith.constant 13 : index
    %c0_91 = arith.constant 0 : index
    %c0_92 = arith.constant 0 : index
    %172 = vector.load %arg4[%c13, %c0_91, %c0_92] : memref<30x128x128xbf16, #tpu.memory_space<vmem>>, vector<1x128x128xbf16>
    %173 = vector.shape_cast %172 : vector<1x128x128xbf16> to vector<128x128xbf16>
    %cst_93 = arith.constant dense<0.000000e+00> : vector<16x128xf32>
    %174 = tpu.matmul %171, %173, %cst_93 {dimension_numbers = #tpu.dot_dimension_numbers<[1], [0], [0], [1], [0, 0, 1, 1], [], []>} : vector<16x128xbf16>, vector<128x128xbf16>, vector<16x128xf32> -> vector<16x128xf32>
    %175 = arith.addf %167, %174 : vector<16x128xf32>
    %c14_i32_94 = arith.constant 14 : i32
    %176 = tpu.dynamic_rotate %147 by %c14_i32_94 dim 0 : vector<16x128xf32>, i32 -> vector<16x128xf32>
    %cst_95 = arith.constant 0.000000e+00 : f32
    %177 = vector.broadcast %cst_95 : f32 to vector<16x128xf32>
    %178 = arith.select %52, %176, %177 : vector<16x128xi1>, vector<16x128xf32>
    %179 = arith.truncf %178 : vector<16x128xf32> to vector<16x128xbf16>
    %c14 = arith.constant 14 : index
    %c0_96 = arith.constant 0 : index
    %c0_97 = arith.constant 0 : index
    %180 = vector.load %arg4[%c14, %c0_96, %c0_97] : memref<30x128x128xbf16, #tpu.memory_space<vmem>>, vector<1x128x128xbf16>
    %181 = vector.shape_cast %180 : vector<1x128x128xbf16> to vector<128x128xbf16>
    %cst_98 = arith.constant dense<0.000000e+00> : vector<16x128xf32>
    %182 = tpu.matmul %179, %181, %cst_98 {dimension_numbers = #tpu.dot_dimension_numbers<[1], [0], [0], [1], [0, 0, 1, 1], [], []>} : vector<16x128xbf16>, vector<128x128xbf16>, vector<16x128xf32> -> vector<16x128xf32>
    %183 = arith.addf %175, %182 : vector<16x128xf32>
    %c2_99 = arith.constant 2 : index
    %c0_100 = arith.constant 0 : index
    %c0_101 = arith.constant 0 : index
    %184 = vector.load %arg5[%c2_99, %c0_100, %c0_101] : memref<6x1x128xf32, #tpu.memory_space<vmem>>, vector<1x1x128xf32>
    %185 = vector.shape_cast %184 : vector<1x1x128xf32> to vector<1x128xf32>
    %186 = vector.broadcast %185 : vector<1x128xf32> to vector<16x128xf32>
    %187 = arith.addf %183, %186 : vector<16x128xf32>
    %cst_102 = arith.constant 0.000000e+00 : f32
    %188 = vector.broadcast %cst_102 : f32 to vector<16x128xf32>
    %189 = arith.maximumf %187, %188 : vector<16x128xf32>
    %190 = arith.truncf %189 : vector<16x128xf32> to vector<16x128xbf16>
    %c17 = arith.constant 17 : index
    %c0_103 = arith.constant 0 : index
    %c0_104 = arith.constant 0 : index
    %191 = vector.load %arg4[%c17, %c0_103, %c0_104] : memref<30x128x128xbf16, #tpu.memory_space<vmem>>, vector<1x128x128xbf16>
    %192 = vector.shape_cast %191 : vector<1x128x128xbf16> to vector<128x128xbf16>
    %cst_105 = arith.constant dense<0.000000e+00> : vector<16x128xf32>
    %193 = tpu.matmul %190, %192, %cst_105 {dimension_numbers = #tpu.dot_dimension_numbers<[1], [0], [0], [1], [0, 0, 1, 1], [], []>} : vector<16x128xbf16>, vector<128x128xbf16>, vector<16x128xf32> -> vector<16x128xf32>
    %c2_i32_106 = arith.constant 2 : i32
    %194 = tpu.dynamic_rotate %189 by %c2_i32_106 dim 0 : vector<16x128xf32>, i32 -> vector<16x128xf32>
    %cst_107 = arith.constant 0.000000e+00 : f32
    %195 = vector.broadcast %cst_107 : f32 to vector<16x128xf32>
    %196 = arith.select %25, %194, %195 : vector<16x128xi1>, vector<16x128xf32>
    %197 = arith.truncf %196 : vector<16x128xf32> to vector<16x128xbf16>
    %c15 = arith.constant 15 : index
    %c0_108 = arith.constant 0 : index
    %c0_109 = arith.constant 0 : index
    %198 = vector.load %arg4[%c15, %c0_108, %c0_109] : memref<30x128x128xbf16, #tpu.memory_space<vmem>>, vector<1x128x128xbf16>
    %199 = vector.shape_cast %198 : vector<1x128x128xbf16> to vector<128x128xbf16>
    %cst_110 = arith.constant dense<0.000000e+00> : vector<16x128xf32>
    %200 = tpu.matmul %197, %199, %cst_110 {dimension_numbers = #tpu.dot_dimension_numbers<[1], [0], [0], [1], [0, 0, 1, 1], [], []>} : vector<16x128xbf16>, vector<128x128xbf16>, vector<16x128xf32> -> vector<16x128xf32>
    %201 = arith.addf %193, %200 : vector<16x128xf32>
    %c1_i32_111 = arith.constant 1 : i32
    %202 = tpu.dynamic_rotate %189 by %c1_i32_111 dim 0 : vector<16x128xf32>, i32 -> vector<16x128xf32>
    %cst_112 = arith.constant 0.000000e+00 : f32
    %203 = vector.broadcast %cst_112 : f32 to vector<16x128xf32>
    %204 = arith.select %34, %202, %203 : vector<16x128xi1>, vector<16x128xf32>
    %205 = arith.truncf %204 : vector<16x128xf32> to vector<16x128xbf16>
    %c16 = arith.constant 16 : index
    %c0_113 = arith.constant 0 : index
    %c0_114 = arith.constant 0 : index
    %206 = vector.load %arg4[%c16, %c0_113, %c0_114] : memref<30x128x128xbf16, #tpu.memory_space<vmem>>, vector<1x128x128xbf16>
    %207 = vector.shape_cast %206 : vector<1x128x128xbf16> to vector<128x128xbf16>
    %cst_115 = arith.constant dense<0.000000e+00> : vector<16x128xf32>
    %208 = tpu.matmul %205, %207, %cst_115 {dimension_numbers = #tpu.dot_dimension_numbers<[1], [0], [0], [1], [0, 0, 1, 1], [], []>} : vector<16x128xbf16>, vector<128x128xbf16>, vector<16x128xf32> -> vector<16x128xf32>
    %209 = arith.addf %201, %208 : vector<16x128xf32>
    %c15_i32_116 = arith.constant 15 : i32
    %210 = tpu.dynamic_rotate %189 by %c15_i32_116 dim 0 : vector<16x128xf32>, i32 -> vector<16x128xf32>
    %cst_117 = arith.constant 0.000000e+00 : f32
    %211 = vector.broadcast %cst_117 : f32 to vector<16x128xf32>
    %212 = arith.select %43, %210, %211 : vector<16x128xi1>, vector<16x128xf32>
    %213 = arith.truncf %212 : vector<16x128xf32> to vector<16x128xbf16>
    %c18 = arith.constant 18 : index
    %c0_118 = arith.constant 0 : index
    %c0_119 = arith.constant 0 : index
    %214 = vector.load %arg4[%c18, %c0_118, %c0_119] : memref<30x128x128xbf16, #tpu.memory_space<vmem>>, vector<1x128x128xbf16>
    %215 = vector.shape_cast %214 : vector<1x128x128xbf16> to vector<128x128xbf16>
    %cst_120 = arith.constant dense<0.000000e+00> : vector<16x128xf32>
    %216 = tpu.matmul %213, %215, %cst_120 {dimension_numbers = #tpu.dot_dimension_numbers<[1], [0], [0], [1], [0, 0, 1, 1], [], []>} : vector<16x128xbf16>, vector<128x128xbf16>, vector<16x128xf32> -> vector<16x128xf32>
    %217 = arith.addf %209, %216 : vector<16x128xf32>
    %c14_i32_121 = arith.constant 14 : i32
    %218 = tpu.dynamic_rotate %189 by %c14_i32_121 dim 0 : vector<16x128xf32>, i32 -> vector<16x128xf32>
    %cst_122 = arith.constant 0.000000e+00 : f32
    %219 = vector.broadcast %cst_122 : f32 to vector<16x128xf32>
    %220 = arith.select %52, %218, %219 : vector<16x128xi1>, vector<16x128xf32>
    %221 = arith.truncf %220 : vector<16x128xf32> to vector<16x128xbf16>
    %c19 = arith.constant 19 : index
    %c0_123 = arith.constant 0 : index
    %c0_124 = arith.constant 0 : index
    %222 = vector.load %arg4[%c19, %c0_123, %c0_124] : memref<30x128x128xbf16, #tpu.memory_space<vmem>>, vector<1x128x128xbf16>
    %223 = vector.shape_cast %222 : vector<1x128x128xbf16> to vector<128x128xbf16>
    %cst_125 = arith.constant dense<0.000000e+00> : vector<16x128xf32>
    %224 = tpu.matmul %221, %223, %cst_125 {dimension_numbers = #tpu.dot_dimension_numbers<[1], [0], [0], [1], [0, 0, 1, 1], [], []>} : vector<16x128xbf16>, vector<128x128xbf16>, vector<16x128xf32> -> vector<16x128xf32>
    %225 = arith.addf %217, %224 : vector<16x128xf32>
    %c3_126 = arith.constant 3 : index
    %c0_127 = arith.constant 0 : index
    %c0_128 = arith.constant 0 : index
    %226 = vector.load %arg5[%c3_126, %c0_127, %c0_128] : memref<6x1x128xf32, #tpu.memory_space<vmem>>, vector<1x1x128xf32>
    %227 = vector.shape_cast %226 : vector<1x1x128xf32> to vector<1x128xf32>
    %228 = vector.broadcast %227 : vector<1x128xf32> to vector<16x128xf32>
    %229 = arith.addf %225, %228 : vector<16x128xf32>
    %cst_129 = arith.constant 3.000000e-01 : f32
    %230 = vector.broadcast %cst_129 : f32 to vector<16x128xf32>
    %231 = arith.mulf %230, %229 : vector<16x128xf32>
    %232 = arith.addf %145, %231 : vector<16x128xf32>
    %cst_130 = arith.constant 0.000000e+00 : f32
    %233 = vector.broadcast %cst_130 : f32 to vector<16x128xf32>
    %234 = arith.maximumf %232, %233 : vector<16x128xf32>
    %235 = arith.truncf %234 : vector<16x128xf32> to vector<16x128xbf16>
    %c22 = arith.constant 22 : index
    %c0_131 = arith.constant 0 : index
    %c0_132 = arith.constant 0 : index
    %236 = vector.load %arg4[%c22, %c0_131, %c0_132] : memref<30x128x128xbf16, #tpu.memory_space<vmem>>, vector<1x128x128xbf16>
    %237 = vector.shape_cast %236 : vector<1x128x128xbf16> to vector<128x128xbf16>
    %cst_133 = arith.constant dense<0.000000e+00> : vector<16x128xf32>
    %238 = tpu.matmul %235, %237, %cst_133 {dimension_numbers = #tpu.dot_dimension_numbers<[1], [0], [0], [1], [0, 0, 1, 1], [], []>} : vector<16x128xbf16>, vector<128x128xbf16>, vector<16x128xf32> -> vector<16x128xf32>
    %c2_i32_134 = arith.constant 2 : i32
    %239 = tpu.dynamic_rotate %234 by %c2_i32_134 dim 0 : vector<16x128xf32>, i32 -> vector<16x128xf32>
    %cst_135 = arith.constant 0.000000e+00 : f32
    %240 = vector.broadcast %cst_135 : f32 to vector<16x128xf32>
    %241 = arith.select %25, %239, %240 : vector<16x128xi1>, vector<16x128xf32>
    %242 = arith.truncf %241 : vector<16x128xf32> to vector<16x128xbf16>
    %c20 = arith.constant 20 : index
    %c0_136 = arith.constant 0 : index
    %c0_137 = arith.constant 0 : index
    %243 = vector.load %arg4[%c20, %c0_136, %c0_137] : memref<30x128x128xbf16, #tpu.memory_space<vmem>>, vector<1x128x128xbf16>
    %244 = vector.shape_cast %243 : vector<1x128x128xbf16> to vector<128x128xbf16>
    %cst_138 = arith.constant dense<0.000000e+00> : vector<16x128xf32>
    %245 = tpu.matmul %242, %244, %cst_138 {dimension_numbers = #tpu.dot_dimension_numbers<[1], [0], [0], [1], [0, 0, 1, 1], [], []>} : vector<16x128xbf16>, vector<128x128xbf16>, vector<16x128xf32> -> vector<16x128xf32>
    %246 = arith.addf %238, %245 : vector<16x128xf32>
    %c1_i32_139 = arith.constant 1 : i32
    %247 = tpu.dynamic_rotate %234 by %c1_i32_139 dim 0 : vector<16x128xf32>, i32 -> vector<16x128xf32>
    %cst_140 = arith.constant 0.000000e+00 : f32
    %248 = vector.broadcast %cst_140 : f32 to vector<16x128xf32>
    %249 = arith.select %34, %247, %248 : vector<16x128xi1>, vector<16x128xf32>
    %250 = arith.truncf %249 : vector<16x128xf32> to vector<16x128xbf16>
    %c21 = arith.constant 21 : index
    %c0_141 = arith.constant 0 : index
    %c0_142 = arith.constant 0 : index
    %251 = vector.load %arg4[%c21, %c0_141, %c0_142] : memref<30x128x128xbf16, #tpu.memory_space<vmem>>, vector<1x128x128xbf16>
    %252 = vector.shape_cast %251 : vector<1x128x128xbf16> to vector<128x128xbf16>
    %cst_143 = arith.constant dense<0.000000e+00> : vector<16x128xf32>
    %253 = tpu.matmul %250, %252, %cst_143 {dimension_numbers = #tpu.dot_dimension_numbers<[1], [0], [0], [1], [0, 0, 1, 1], [], []>} : vector<16x128xbf16>, vector<128x128xbf16>, vector<16x128xf32> -> vector<16x128xf32>
    %254 = arith.addf %246, %253 : vector<16x128xf32>
    %c15_i32_144 = arith.constant 15 : i32
    %255 = tpu.dynamic_rotate %234 by %c15_i32_144 dim 0 : vector<16x128xf32>, i32 -> vector<16x128xf32>
    %cst_145 = arith.constant 0.000000e+00 : f32
    %256 = vector.broadcast %cst_145 : f32 to vector<16x128xf32>
    %257 = arith.select %43, %255, %256 : vector<16x128xi1>, vector<16x128xf32>
    %258 = arith.truncf %257 : vector<16x128xf32> to vector<16x128xbf16>
    %c23 = arith.constant 23 : index
    %c0_146 = arith.constant 0 : index
    %c0_147 = arith.constant 0 : index
    %259 = vector.load %arg4[%c23, %c0_146, %c0_147] : memref<30x128x128xbf16, #tpu.memory_space<vmem>>, vector<1x128x128xbf16>
    %260 = vector.shape_cast %259 : vector<1x128x128xbf16> to vector<128x128xbf16>
    %cst_148 = arith.constant dense<0.000000e+00> : vector<16x128xf32>
    %261 = tpu.matmul %258, %260, %cst_148 {dimension_numbers = #tpu.dot_dimension_numbers<[1], [0], [0], [1], [0, 0, 1, 1], [], []>} : vector<16x128xbf16>, vector<128x128xbf16>, vector<16x128xf32> -> vector<16x128xf32>
    %262 = arith.addf %254, %261 : vector<16x128xf32>
    %c14_i32_149 = arith.constant 14 : i32
    %263 = tpu.dynamic_rotate %234 by %c14_i32_149 dim 0 : vector<16x128xf32>, i32 -> vector<16x128xf32>
    %cst_150 = arith.constant 0.000000e+00 : f32
    %264 = vector.broadcast %cst_150 : f32 to vector<16x128xf32>
    %265 = arith.select %52, %263, %264 : vector<16x128xi1>, vector<16x128xf32>
    %266 = arith.truncf %265 : vector<16x128xf32> to vector<16x128xbf16>
    %c24 = arith.constant 24 : index
    %c0_151 = arith.constant 0 : index
    %c0_152 = arith.constant 0 : index
    %267 = vector.load %arg4[%c24, %c0_151, %c0_152] : memref<30x128x128xbf16, #tpu.memory_space<vmem>>, vector<1x128x128xbf16>
    %268 = vector.shape_cast %267 : vector<1x128x128xbf16> to vector<128x128xbf16>
    %cst_153 = arith.constant dense<0.000000e+00> : vector<16x128xf32>
    %269 = tpu.matmul %266, %268, %cst_153 {dimension_numbers = #tpu.dot_dimension_numbers<[1], [0], [0], [1], [0, 0, 1, 1], [], []>} : vector<16x128xbf16>, vector<128x128xbf16>, vector<16x128xf32> -> vector<16x128xf32>
    %270 = arith.addf %262, %269 : vector<16x128xf32>
    %c4_154 = arith.constant 4 : index
    %c0_155 = arith.constant 0 : index
    %c0_156 = arith.constant 0 : index
    %271 = vector.load %arg5[%c4_154, %c0_155, %c0_156] : memref<6x1x128xf32, #tpu.memory_space<vmem>>, vector<1x1x128xf32>
    %272 = vector.shape_cast %271 : vector<1x1x128xf32> to vector<1x128xf32>
    %273 = vector.broadcast %272 : vector<1x128xf32> to vector<16x128xf32>
    %274 = arith.addf %270, %273 : vector<16x128xf32>
    %cst_157 = arith.constant 0.000000e+00 : f32
    %275 = vector.broadcast %cst_157 : f32 to vector<16x128xf32>
    %276 = arith.maximumf %274, %275 : vector<16x128xf32>
    %277 = arith.truncf %276 : vector<16x128xf32> to vector<16x128xbf16>
    %c27 = arith.constant 27 : index
    %c0_158 = arith.constant 0 : index
    %c0_159 = arith.constant 0 : index
    %278 = vector.load %arg4[%c27, %c0_158, %c0_159] : memref<30x128x128xbf16, #tpu.memory_space<vmem>>, vector<1x128x128xbf16>
    %279 = vector.shape_cast %278 : vector<1x128x128xbf16> to vector<128x128xbf16>
    %cst_160 = arith.constant dense<0.000000e+00> : vector<16x128xf32>
    %280 = tpu.matmul %277, %279, %cst_160 {dimension_numbers = #tpu.dot_dimension_numbers<[1], [0], [0], [1], [0, 0, 1, 1], [], []>} : vector<16x128xbf16>, vector<128x128xbf16>, vector<16x128xf32> -> vector<16x128xf32>
    %c2_i32_161 = arith.constant 2 : i32
    %281 = tpu.dynamic_rotate %276 by %c2_i32_161 dim 0 : vector<16x128xf32>, i32 -> vector<16x128xf32>
    %cst_162 = arith.constant 0.000000e+00 : f32
    %282 = vector.broadcast %cst_162 : f32 to vector<16x128xf32>
    %283 = arith.select %25, %281, %282 : vector<16x128xi1>, vector<16x128xf32>
    %284 = arith.truncf %283 : vector<16x128xf32> to vector<16x128xbf16>
    %c25 = arith.constant 25 : index
    %c0_163 = arith.constant 0 : index
    %c0_164 = arith.constant 0 : index
    %285 = vector.load %arg4[%c25, %c0_163, %c0_164] : memref<30x128x128xbf16, #tpu.memory_space<vmem>>, vector<1x128x128xbf16>
    %286 = vector.shape_cast %285 : vector<1x128x128xbf16> to vector<128x128xbf16>
    %cst_165 = arith.constant dense<0.000000e+00> : vector<16x128xf32>
    %287 = tpu.matmul %284, %286, %cst_165 {dimension_numbers = #tpu.dot_dimension_numbers<[1], [0], [0], [1], [0, 0, 1, 1], [], []>} : vector<16x128xbf16>, vector<128x128xbf16>, vector<16x128xf32> -> vector<16x128xf32>
    %288 = arith.addf %280, %287 : vector<16x128xf32>
    %c1_i32_166 = arith.constant 1 : i32
    %289 = tpu.dynamic_rotate %276 by %c1_i32_166 dim 0 : vector<16x128xf32>, i32 -> vector<16x128xf32>
    %cst_167 = arith.constant 0.000000e+00 : f32
    %290 = vector.broadcast %cst_167 : f32 to vector<16x128xf32>
    %291 = arith.select %34, %289, %290 : vector<16x128xi1>, vector<16x128xf32>
    %292 = arith.truncf %291 : vector<16x128xf32> to vector<16x128xbf16>
    %c26 = arith.constant 26 : index
    %c0_168 = arith.constant 0 : index
    %c0_169 = arith.constant 0 : index
    %293 = vector.load %arg4[%c26, %c0_168, %c0_169] : memref<30x128x128xbf16, #tpu.memory_space<vmem>>, vector<1x128x128xbf16>
    %294 = vector.shape_cast %293 : vector<1x128x128xbf16> to vector<128x128xbf16>
    %cst_170 = arith.constant dense<0.000000e+00> : vector<16x128xf32>
    %295 = tpu.matmul %292, %294, %cst_170 {dimension_numbers = #tpu.dot_dimension_numbers<[1], [0], [0], [1], [0, 0, 1, 1], [], []>} : vector<16x128xbf16>, vector<128x128xbf16>, vector<16x128xf32> -> vector<16x128xf32>
    %296 = arith.addf %288, %295 : vector<16x128xf32>
    %c15_i32_171 = arith.constant 15 : i32
    %297 = tpu.dynamic_rotate %276 by %c15_i32_171 dim 0 : vector<16x128xf32>, i32 -> vector<16x128xf32>
    %cst_172 = arith.constant 0.000000e+00 : f32
    %298 = vector.broadcast %cst_172 : f32 to vector<16x128xf32>
    %299 = arith.select %43, %297, %298 : vector<16x128xi1>, vector<16x128xf32>
    %300 = arith.truncf %299 : vector<16x128xf32> to vector<16x128xbf16>
    %c28 = arith.constant 28 : index
    %c0_173 = arith.constant 0 : index
    %c0_174 = arith.constant 0 : index
    %301 = vector.load %arg4[%c28, %c0_173, %c0_174] : memref<30x128x128xbf16, #tpu.memory_space<vmem>>, vector<1x128x128xbf16>
    %302 = vector.shape_cast %301 : vector<1x128x128xbf16> to vector<128x128xbf16>
    %cst_175 = arith.constant dense<0.000000e+00> : vector<16x128xf32>
    %303 = tpu.matmul %300, %302, %cst_175 {dimension_numbers = #tpu.dot_dimension_numbers<[1], [0], [0], [1], [0, 0, 1, 1], [], []>} : vector<16x128xbf16>, vector<128x128xbf16>, vector<16x128xf32> -> vector<16x128xf32>
    %304 = arith.addf %296, %303 : vector<16x128xf32>
    %c14_i32_176 = arith.constant 14 : i32
    %305 = tpu.dynamic_rotate %276 by %c14_i32_176 dim 0 : vector<16x128xf32>, i32 -> vector<16x128xf32>
    %cst_177 = arith.constant 0.000000e+00 : f32
    %306 = vector.broadcast %cst_177 : f32 to vector<16x128xf32>
    %307 = arith.select %52, %305, %306 : vector<16x128xi1>, vector<16x128xf32>
    %308 = arith.truncf %307 : vector<16x128xf32> to vector<16x128xbf16>
    %c29 = arith.constant 29 : index
    %c0_178 = arith.constant 0 : index
    %c0_179 = arith.constant 0 : index
    %309 = vector.load %arg4[%c29, %c0_178, %c0_179] : memref<30x128x128xbf16, #tpu.memory_space<vmem>>, vector<1x128x128xbf16>
    %310 = vector.shape_cast %309 : vector<1x128x128xbf16> to vector<128x128xbf16>
    %cst_180 = arith.constant dense<0.000000e+00> : vector<16x128xf32>
    %311 = tpu.matmul %308, %310, %cst_180 {dimension_numbers = #tpu.dot_dimension_numbers<[1], [0], [0], [1], [0, 0, 1, 1], [], []>} : vector<16x128xbf16>, vector<128x128xbf16>, vector<16x128xf32> -> vector<16x128xf32>
    %312 = arith.addf %304, %311 : vector<16x128xf32>
    %c5_181 = arith.constant 5 : index
    %c0_182 = arith.constant 0 : index
    %c0_183 = arith.constant 0 : index
    %313 = vector.load %arg5[%c5_181, %c0_182, %c0_183] : memref<6x1x128xf32, #tpu.memory_space<vmem>>, vector<1x1x128xf32>
    %314 = vector.shape_cast %313 : vector<1x1x128xf32> to vector<1x128xf32>
    %315 = vector.broadcast %314 : vector<1x128xf32> to vector<16x128xf32>
    %316 = arith.addf %312, %315 : vector<16x128xf32>
    %cst_184 = arith.constant 3.000000e-01 : f32
    %317 = vector.broadcast %cst_184 : f32 to vector<16x128xf32>
    %318 = arith.mulf %317, %316 : vector<16x128xf32>
    %319 = arith.addf %232, %318 : vector<16x128xf32>
    %320 = vector.extract_strided_slice %319 {offsets = [0, 0], sizes = [8, 128], strides = [1, 1]} : vector<16x128xf32> to vector<8x128xf32>
    %cst_185 = arith.constant dense<0.000000e+00> : vector<128xf32>
    %321 = vector.multi_reduction <add>, %320, %cst_185 [0] : vector<8x128xf32> to vector<128xf32>
    %322 = vector.shape_cast %321 : vector<128xf32> to vector<1x128xf32>
    %cst_186 = arith.constant 8.000000e+00 : f32
    %323 = vector.broadcast %cst_186 : f32 to vector<1x128xf32>
    %324 = arith.divf %322, %323 : vector<1x128xf32>
    %325 = vector.extract_strided_slice %319 {offsets = [8, 0], sizes = [8, 128], strides = [1, 1]} : vector<16x128xf32> to vector<8x128xf32>
    %cst_187 = arith.constant dense<0.000000e+00> : vector<128xf32>
    %326 = vector.multi_reduction <add>, %325, %cst_187 [0] : vector<8x128xf32> to vector<128xf32>
    %327 = vector.shape_cast %326 : vector<128xf32> to vector<1x128xf32>
    %cst_188 = arith.constant 8.000000e+00 : f32
    %328 = vector.broadcast %cst_188 : f32 to vector<1x128xf32>
    %329 = arith.divf %327, %328 : vector<1x128xf32>
    %330 = tpu.concatenate %324, %329 in 0 : vector<1x128xf32>, vector<1x128xf32> -> vector<2x128xf32>
    %c0_189 = arith.constant 0 : index
    %c0_190 = arith.constant 0 : index
    %331 = vector.load %arg6[%c0_189, %c0_190] : memref<1x128xf32, #tpu.memory_space<vmem>>, vector<1x128xf32>
    %332 = vector.broadcast %331 : vector<1x128xf32> to vector<2x128xf32>
    %333 = arith.mulf %330, %332 : vector<2x128xf32>
    %cst_191 = arith.constant dense<0.000000e+00> : vector<2xf32>
    %334 = vector.multi_reduction <add>, %333, %cst_191 [1] : vector<2x128xf32> to vector<2xf32>
    %335 = vector.shape_cast %334 : vector<2xf32> to vector<2x1xf32>
    %c0_192 = arith.constant 0 : index
    %c0_193 = arith.constant 0 : index
    %336 = vector.load %arg7[%c0_192, %c0_193] : memref<1x1xf32, #tpu.memory_space<vmem>>, vector<1x1xf32>
    %337 = vector.broadcast %336 : vector<1x1xf32> to vector<2x1xf32>
    %338 = arith.addf %335, %337 : vector<2x1xf32>
    %c0_194 = arith.constant 0 : index
    %c0_195 = arith.constant 0 : index
    %339 = vector.load %arg8[%c0_194, %c0_195] : memref<2x1xf32, #tpu.memory_space<vmem>>, vector<2x1xf32>
    tpu.vector_store %arg8[%c0_194, %c0_195], %338 {strides = array<i32>} : memref<2x1xf32, #tpu.memory_space<vmem>>, vector<2x1xf32>,
    return
  }
  func.func @transform_0(%arg0: i32) -> (i32, i32) {
    %c0_i32 = arith.constant 0 : i32
    %c0_i32_0 = arith.constant 0 : i32
    %c0_i32_1 = arith.constant 0 : i32
    return %c0_i32, %c0_i32_0 : i32, i32
  }
  func.func @transform_1(%arg0: i32) -> (i32, i32) {
    %c0_i32 = arith.constant 0 : i32
    %c0_i32_0 = arith.constant 0 : i32
    %c0_i32_1 = arith.constant 0 : i32
    return %c0_i32, %c0_i32_0 : i32, i32
  }
  func.func @transform_2(%arg0: i32) -> (i32, i32) {
    %c0_i32 = arith.constant 0 : i32
    %c0_i32_0 = arith.constant 0 : i32
    %c0_i32_1 = arith.constant 0 : i32
    return %c0_i32, %c0_i32_0 : i32, i32
  }
  func.func @transform_3(%arg0: i32) -> (i32, i32, i32) {
    %c0_i32 = arith.constant 0 : i32
    %c0_i32_0 = arith.constant 0 : i32
    %c0_i32_1 = arith.constant 0 : i32
    %c0_i32_2 = arith.constant 0 : i32
    return %c0_i32, %c0_i32_0, %c0_i32_1 : i32, i32, i32
  }
  func.func @transform_4(%arg0: i32) -> (i32, i32, i32) {
    %c0_i32 = arith.constant 0 : i32
    %c0_i32_0 = arith.constant 0 : i32
    %c0_i32_1 = arith.constant 0 : i32
    %c0_i32_2 = arith.constant 0 : i32
    return %c0_i32, %c0_i32_0, %c0_i32_1 : i32, i32, i32
  }
  func.func @transform_5(%arg0: i32) -> (i32, i32) {
    %c0_i32 = arith.constant 0 : i32
    %c0_i32_0 = arith.constant 0 : i32
    %c0_i32_1 = arith.constant 0 : i32
    return %c0_i32, %c0_i32_0 : i32, i32
  }
  func.func @transform_6(%arg0: i32) -> (i32, i32) {
    %c0_i32 = arith.constant 0 : i32
    %c0_i32_0 = arith.constant 0 : i32
    %c0_i32_1 = arith.constant 0 : i32
    return %c0_i32, %c0_i32_0 : i32, i32
  }
  func.func @transform_7(%arg0: i32) -> (i32, i32) {
    %c0_i32 = arith.constant 0 : i32
    %c0_i32_0 = arith.constant 0 : i32
    %c0_i32_1 = arith.constant 0 : i32
    return %c0_i32, %c0_i32_0 : i32, i32
  }
}

</mosaic_0001>

<bundles_post_ra>
// kernel: adversarial_discriminator.1
= control target key start
LH: loop header
LB: loop body
LE: loop exit
PB: predicated region body
PF: predicated region fallthrough
CT: control target
= control target key end

     0   :  { %v5602_v0 = vmov 0.0   ;;  %vm5603_vm0 = vmmov 0   ;;  %vm118_vm1 = vcmask 261120   ;;  %v29_v20 = vlaneseq  ;;  %s7007_s1 = inlined_call_operand.vmem [shape: bf16[32,128], index: 1, kind: input, shape index: {}]   ;;  %s7008_s0 = inlined_call_operand.vmem [shape: bf16[16,32], index: 0, kind: input, shape index: {}]   ;;  %s7009_s3 = inlined_call_operand.vmem [shape: bf16[30,128,128], index: 3, kind: input, shape index: {}]   ;;  %s7010_s2 = inlined_call_operand.vmem [shape: f32[1,128], index: 2, kind: input, shape index: {}]   ;;  %s7011_s4 = inlined_call_operand.vmem [shape: f32[6,1,128], index: 4, kind: input, shape index: {}]   ;;  %s7012_s6 = inlined_call_operand.<no memory space> [shape: f32[1,1], index: 6, kind: input, shape index: {}]   ;;  %s7013_s5 = inlined_call_operand.vmem [shape: f32[1,128], index: 5, kind: input, shape index: {}]   ;;  %s7014_s7 = inlined_call_operand.vmem [shape: f32[2,1], index: 7, kind: output, shape index: {}]  }
   0x1   :  { %4749 = vmatprep.subr.bf16.mxu0 %v5602_v0  ;;  %v5359_v1 = vld [vmem:[%s7007_s1] sm:$0xff]   ;;  %4753 = vmatprep.mubr.msk.bf16.mxu0 %vm5603_vm0, %v5602_v0  ;;  %v5360_v2 = vld [vmem:[%s7007_s1 + $0x8] sm:$0xff]   ;;  %v5367_v8 = vld [vmem:[%s7009_s3 + $0x10] sm:$0xff]  }
   0x2   :  { %4757 = vmatprep.subr.bf16.mxu1 %v5602_v0  ;;  %4773 = vmatprep.mubr.msk.bf16.mxu1 %vm5603_vm0, %v5602_v0  ;;  %v5361_v3 = vld [vmem:[%s7008_s0] sm:$0xff]   ;;  %v5365_v6 = vld [vmem:[%s7009_s3 + $0x8] sm:$0xff]   ;;  %v5366_v9 = vld [vmem:[%s7009_s3 + $0x90] sm:$0xff]   ;;  %v5727_v21 = vshrl.u32 %v29_v20, 7 }
   0x3   :  { %4750 = vmatpush3.bf16.msra.mxu0 %v5359_v1  ;;  %v5363_v4 = vld [vmem:[%s7009_s3] sm:$0xff]   ;;  %v5364_v7 = vld [vmem:[%s7009_s3 + $0x88] sm:$0xff]   ;;  %v5369_v10 = vld [vmem:[%s7009_s3 + $0x18] sm:$0xff]  }
   0x4   :  { %4751 = vmatprep.subr.bf16.mxu0 %v5602_v0  ;;  %v5362_v5 = vld [vmem:[%s7009_s3 + $0x80] sm:$0xff]   ;;  %4758 = vmatpush3.bf16.msra.mxu1 %v5363_v4  ;;  %v5368_v11 = vld [vmem:[%s7009_s3 + $0x98] sm:$0xff]   ;;  %v5372_v14 = vld [vmem:[%s7009_s3 + $0xa8] sm:$0xff]   ;;  %v31_v22 = vadd.s32 8, %v5727_v21  ;;  %v5731_v23 = vand.u32 7, %v5727_v21  ;;  %vm185_vm5 = vcmp.lt.s32.totalorder %v5727_v21, 2 }
   0x5   :  { %4759 = vmatprep.subr.bf16.mxu1 %v5602_v0  ;;  %v5371_v12 = vld [vmem:[%s7009_s3 + $0x20] sm:$0xff]   ;;  %v5373_v15 = vld [vmem:[%s7009_s3 + $0x28] sm:$0xff]   ;;  %v5374_v16 = vld [vmem:[%s7009_s3 + $0xb0] sm:$0xff]   ;;  %vm619_vm8 = vcmp.lt.s32.totalorder %v5727_v21, 6  ;;  %vm503_vm10 = vcmp.lt.s32.totalorder %v5727_v21, 7  ;;  %vm387_vm13 = vcmp.lt.s32.totalorder %v5727_v21, 1 }
   0x6   :  { %v5370_v13 = vld [vmem:[%s7009_s3 + $0xa0] sm:$0xff]   ;;  %v5375_v17 = vld [vmem:[%s7009_s3 + $0x30] sm:$0xff]   ;;  %v5376_v18 = vld [vmem:[%s7009_s3 + $0xb8] sm:$0xff]   ;;  %v5733_v24 = vand.u32 7, %v31_v22  ;;  %v80_v25 = vadd.s32 2, %v5731_v23  ;;  %v56_v35 = vadd.s32 4294967294, %v5731_v23 }
   0x7   :  { %4752 = vmatpush3.bf16.msra.mxu0 %v5360_v2  ;;  %v5377_v19 = vld [vmem:[%s7009_s3 + $0x38] sm:$0xff]   ;;  %v3682_v28 = vld [vmem:[%s7010_s2] ss:$0 sm:$0xff]  ;;  %v5380_v49 = vld [vmem:[%s7009_s3 + $0xc8] sm:$0xff]   ;;  %v72_v1 = vadd.s32 1, %v5731_v23 }
   0x8   :  { %4777 = vmatprep.subr.bf16.mxu0 %v5602_v0  ;;  %4760 = vmatpush3.bf16.msra.mxu1 %v5365_v6  ;;  %v81_v26 = vadd.s32 2, %v5733_v24  ;;  %vm84_vm2 = vcmp.lt.s32.totalorder %v80_v25, 8  ;;  %v57_v36 = vadd.s32 4294967294, %v5733_v24  ;;  %v5378_v39 = vld [vmem:[%s7009_s3 + $0xc0] sm:$0xff]   ;;  %vm58_vm6 = vcmp.ge.s32.totalorder %v56_v35, 0  ;;  %v5381_v54 = vld [vmem:[%s7009_s3 + $0x48] sm:$0xff]  }
   0x9   :  { %4761 = vmatprep.subr.bf16.mxu1 %v5602_v0  ;;  %v5379_v48 = vld [vmem:[%s7009_s3 + $0x40] sm:$0xff]   ;;  %v5382_v55 = vld [vmem:[%s7009_s3 + $0xd0] sm:$0xff]   ;;  %v5384_v57 = vld [vmem:[%s7009_s3 + $0xd8] sm:$0xff]   ;;  %v73_v2 = vadd.s32 1, %v5733_v24  ;;  %vm76_vm11 = vcmp.lt.s32.totalorder %v72_v1, 8 }
   0xa   :  { %4754 = vmatmul.mubr.msk.bf16.vlgmr.msra.gmra.mrb[0].mxu0 %vm118_vm1, %v5361_v3  ;;  %vm85_vm3 = vcmp.lt.s32.totalorder %v81_v26, 8  ;;  %vm59_vm7 = vcmp.ge.s32.totalorder %v57_v36, 0  ;;  %v5383_v56 = vld [vmem:[%s7009_s3 + $0x50] sm:$0xff]   ;;  %v5385_v58 = vld [vmem:[%s7009_s3 + $0x58] sm:$0xff]   ;;  %v5386_v59 = vld [vmem:[%s7009_s3 + $0xe0] sm:$0xff]  }
   0xb   :  { %4778 = vmatpush3.bf16.msra.mxu0 %v5362_v5  ;;  %4793 = vmatprep.mubr.msk.bf16.mxu0 %vm5603_vm0, %v5602_v0  ;;  %vm5737_vm4 = vmpackc.low %vm85_vm3, %vm84_vm2  ;;  %v5387_v60 = vld [vmem:[%s7009_s3 + $0x60] sm:$0xff]   ;;  %v5388_v61 = vld [vmem:[%s7009_s3 + $0xe8] sm:$0xff]   ;;  %vm77_vm12 = vcmp.lt.s32.totalorder %v73_v2, 8  ;;  %vm3664_vm3 = vcmask 1041408  }
   0xc   :  { %4779 = vmatprep.subr.bf16.mxu0 %v5602_v0  ;;  %4762 = vmatpush3.bf16.msra.mxu1 %v5367_v8  ;;  %vm5771_vm9 = vmpackc.low %vm59_vm7, %vm58_vm6  ;;  %v5389_v62 = vld [vmem:[%s7009_s3 + $0x68] sm:$0xff]   ;;  %v5390_v63 = vld [vmem:[%s7009_s3 + $0xf0] sm:$0xff]   ;;  %v65_v8 = vadd.s32 4294967295, %v5733_v24 }
   0xd   :  { %4763 = vmatprep.subr.bf16.mxu1 %v5602_v0  ;;  %v5391_v5 = vld [vmem:[%s7009_s3 + $0x70] sm:$0xff]   ;;  %v5392_v6 = vld [vmem:[%s7009_s3 + $0xf8] sm:$0xff]   ;;  %vm5863_vm14 = vmpackc.low %vm77_vm12, %vm76_vm11 }
   0xe   :  { %vm67_vm1 = vcmp.ge.s32.totalorder %v65_v8, 0  ;;  %v5395_v22 = vld [vmem:[%s7009_s3 + $0x108] sm:$0xff]   ;;  %v5397_v24 = vld [vmem:[%s7009_s3 + $0x118] sm:$0xff]   ;;  %v5398_v25 = vld [vmem:[%s7009_s3 + $0x120] sm:$0xff]  }
   0xf   :  { %4780 = vmatpush3.bf16.msra.mxu0 %v5364_v7  ;;  %v64_v7 = vadd.s32 4294967295, %v5731_v23  ;;  %v5396_v23 = vld [vmem:[%s7009_s3 + $0x110] sm:$0xff]   ;;  %v5399_v26 = vld [vmem:[%s7009_s3 + $0x128] sm:$0xff]  }
  0x10   :  { %4781 = vmatprep.subr.bf16.mxu0 %v5602_v0  ;;  %4764 = vmatpush3.bf16.msra.mxu1 %v5369_v10  ;;  %v5405_v35 = vld [vmem:[%s7009_s3 + $0x148] sm:$0xff]   ;;  %v5406_v36 = vld [vmem:[%s7009_s3 + $0x1d0] sm:$0xff]  }
  0x11   :  { %4765 = vmatprep.subr.bf16.mxu1 %v5602_v0  ;;  %vm66_vm15 = vcmp.ge.s32.totalorder %v64_v7, 0  ;;  %v5582_v21 = vld [vmem:[%s7009_s3 + $0x710] sm:$0xff]  }
  0x12   :  { %vm5875_vm2 = vmpackc.low %vm67_vm1, %vm66_vm15  ;;  %v5583_v47 = vld [vmem:[%s7009_s3 + $0x690] sm:$0xff]  }
  0x13   :  { %4782 = vmatpush3.bf16.msra.mxu0 %v5366_v9 }
  0x14   :  { %4783 = vmatprep.subr.bf16.mxu0 %v5602_v0  ;;  %4766 = vmatpush3.bf16.msra.mxu1 %v5371_v12 }
  0x15   :  { %4767 = vmatprep.subr.bf16.mxu1 %v5602_v0 }
  0x17   :  { %4784 = vmatpush3.bf16.msra.mxu0 %v5368_v11 }
  0x18   :  { %4785 = vmatprep.subr.bf16.mxu0 %v5602_v0  ;;  %4768 = vmatpush3.bf16.msra.mxu1 %v5373_v15 }
  0x19   :  { %4769 = vmatprep.subr.bf16.mxu1 %v5602_v0 }
  0x1b   :  { %4786 = vmatpush3.bf16.msra.mxu0 %v5370_v13  ;;  %v5393_v13 = vld [vmem:[%s7009_s3 + $0x78] sm:$0xff]  }
  0x1c   :  { %4787 = vmatprep.subr.bf16.mxu0 %v5602_v0  ;;  %4770 = vmatpush3.bf16.msra.mxu1 %v5375_v17 }
  0x1d   :  { %4771 = vmatprep.subr.bf16.mxu1 %v5602_v0 }
  0x1f   :  { %4788 = vmatpush3.bf16.msra.mxu0 %v5372_v14  ;;  %v5596_v14 = vld [vmem:[%s7009_s3 + $0x750] sm:$0xff]  }
  0x20   :  { %4789 = vmatprep.subr.bf16.mxu0 %v5602_v0  ;;  %4772 = vmatpush3.bf16.msra.mxu1 %v5377_v19  ;;  %v5394_v19 = vld [vmem:[%s7009_s3 + $0x100] sm:$0xff]  }
  0x21   :  { %4797 = vmatprep.subr.bf16.mxu1 %v5602_v0 }
  0x23   :  { %4790 = vmatpush3.bf16.msra.mxu0 %v5374_v16 }
  0x24   :  { %4791 = vmatprep.subr.bf16.mxu0 %v5602_v0 }
  0x27   :  { %4792 = vmatpush3.bf16.msra.mxu0 %v5376_v18  ;;  %v5597_v18 = vld [vmem:[%s7009_s3 + $0x758] sm:$0xff]  }
  0x28   :  { %4817 = vmatprep.subr.bf16.mxu0 %v5602_v0 }
  0xdd   :  { %v156_v29 = vpop.f32.mrb[0].mxu0 }
  0xde   :  { %v5744_v30 = vadd.f32 %v3682_v28, %v156_v29  ;;  %v4755_v31 = vpop.f32.mrb[1].mxu0  ;;  %v5401_v29 = vld [vmem:[%s7009_s3 + $0x138] sm:$0xff]  }
  0xdf   :  { %v159_v32 = vpop.f32.mrb[2].mxu0  ;;  %v5402_v31 = vld [vmem:[%s7009_s3 + $0x1c0] sm:$0xff]  }
  0xe0   :  { %v5746_v33 = vadd.f32 %v3682_v28, %v159_v32  ;;  %v4756_v34 = vpop.f32.mrb[3].mxu0  ;;  %v5751_v37 = vmax.f32 %v5744_v30, 0.0  ;;  %v5400_v28 = vld [vmem:[%s7009_s3 + $0x130] sm:$0xff]   ;;  %v5403_v32 = vld [vmem:[%s7009_s3 + $0x140] sm:$0xff]  }
  0xe1   :  { %v5404_v34 = vld [vmem:[%s7009_s3 + $0x1c8] sm:$0xff]  }
  0xe2   :  { %v5754_v38 = vmax.f32 %v5746_v33, 0.0  ;;  %v183_v42 = vrot.slane %v5751_v37, 6  ;;  %v617_v44 = vrot.slane %v5751_v37, 2  ;;  %v501_v4 = vrot.slane %v5751_v37, 1 }
  0xe3   :  { %v385_v12 = vrot.slane %v5751_v37, 7 }
  0xe4   :  { %v618_v40 = vrot.slane %v5754_v38, 2  ;;  %v165_v41 = vpack.c.bf16 %v5754_v38, %v5751_v37  ;;  %v184_v43 = vrot.slane %v5754_v38, 6  ;;  %v502_v3 = vrot.slane %v5754_v38, 1  ;;  %v5407_v37 = vld [vmem:[%s7009_s3 + $0x150] sm:$0xff]  }
  0xe5   :  { %v386_v9 = vrot.slane %v5754_v38, 7  ;;  %v5408_v38 = vld [vmem:[%s7009_s3 + $0x1d8] sm:$0xff]  }
  0xe6   :  { %4794 = vmatmul.mubr.bf16.vlgmr.msra.gmra.mrb[4].mxu0 %v165_v41  ;;  %v186_v45 = vsel %vm185_vm5, %v183_v42, %v184_v43  ;;  %v187_v46 = vsel %vm185_vm5, %v184_v43, %v183_v42  ;;  %v5786_v51 = vsel %vm619_vm8, %v617_v44, %v618_v40  ;;  %v5790_v52 = vsel %vm619_vm8, %v618_v40, %v617_v44  ;;  %v5410_v40 = vld [vmem:[%s7009_s3 + $0x1e0] sm:$0xff]   ;;  %v5412_v42 = vld [vmem:[%s7009_s3 + $0x1e8] sm:$0xff]   ;;  %v5414_v44 = vld [vmem:[%s7009_s3 + $0x1f0] sm:$0xff]  }
  0xe7   :  { %4818 = vmatpush3.bf16.msra.mxu0 %v5378_v39  ;;  %4833 = vmatprep.mubr.msk.bf16.mxu0 %vm5603_vm0, %v5602_v0  ;;  %v3712_v50 = vpack.c.bf16 %v186_v45, %v187_v46  ;;  %v3801_v53 = vpack.c.bf16 %v5790_v52, %v5786_v51  ;;  %v504_v10 = vsel %vm503_vm10, %v501_v4, %v502_v3  ;;  %v5409_v39 = vld [vmem:[%s7009_s3 + $0x158] sm:$0xff]   ;;  %v5411_v41 = vld [vmem:[%s7009_s3 + $0x160] sm:$0xff]   ;;  %v5413_v43 = vld [vmem:[%s7009_s3 + $0x168] sm:$0xff]  }
  0xe8   :  { %4819 = vmatprep.subr.bf16.mxu0 %v5602_v0  ;;  %v505_v11 = vsel %vm503_vm10, %v502_v3, %v501_v4  ;;  %v388_v16 = vsel %vm387_vm13, %v385_v12, %v386_v9  ;;  %v389_v17 = vsel %vm387_vm13, %v386_v9, %v385_v12  ;;  %v5415_v45 = vld [vmem:[%s7009_s3 + $0x170] sm:$0xff]   ;;  %v5416_v46 = vld [vmem:[%s7009_s3 + $0x1f8] sm:$0xff]   ;;  %v3803_v9 = vld [vmem:[%s7011_s4] ss:$0 sm:$0xff] }
  0xe9   :  { %4774 = vmatmul.mubr.msk.bf16.vlgmr.msra.gmra.mrb[0].mxu1 %vm5771_vm9, %v3712_v50  ;;  %v3774_v15 = vpack.c.bf16 %v505_v11, %v504_v10  ;;  %v3747_v20 = vpack.c.bf16 %v388_v16, %v389_v17 }
  0xea   :  { %4798 = vmatpush3.bf16.msra.mxu1 %v5379_v48  ;;  %4813 = vmatprep.mubr.msk.bf16.mxu1 %vm5603_vm0, %v5602_v0  ;;  %v5417_v48 = vld [vmem:[%s7009_s3 + $0x178] sm:$0xff]  }
  0xeb   :  { %4820 = vmatpush3.bf16.msra.mxu0 %v5380_v49  ;;  %4799 = vmatprep.subr.bf16.mxu1 %v5602_v0 }
  0xec   :  { %4821 = vmatprep.subr.bf16.mxu0 %v5602_v0 }
  0xee   :  { %4800 = vmatpush3.bf16.msra.mxu1 %v5381_v54 }
  0xef   :  { %4822 = vmatpush3.bf16.msra.mxu0 %v5382_v55  ;;  %4801 = vmatprep.subr.bf16.mxu1 %v5602_v0 }
  0xf0   :  { %4823 = vmatprep.subr.bf16.mxu0 %v5602_v0 }
  0xf2   :  { %4802 = vmatpush3.bf16.msra.mxu1 %v5383_v56 }
  0xf3   :  { %4824 = vmatpush3.bf16.msra.mxu0 %v5384_v57  ;;  %4803 = vmatprep.subr.bf16.mxu1 %v5602_v0 }
  0xf4   :  { %4825 = vmatprep.subr.bf16.mxu0 %v5602_v0 }
  0xf6   :  { %4804 = vmatpush3.bf16.msra.mxu1 %v5385_v58 }
  0xf7   :  { %4826 = vmatpush3.bf16.msra.mxu0 %v5386_v59  ;;  %4805 = vmatprep.subr.bf16.mxu1 %v5602_v0 }
  0xf8   :  { %4827 = vmatprep.subr.bf16.mxu0 %v5602_v0 }
  0xfa   :  { %4806 = vmatpush3.bf16.msra.mxu1 %v5387_v60 }
  0xfb   :  { %4828 = vmatpush3.bf16.msra.mxu0 %v5388_v61  ;;  %4807 = vmatprep.subr.bf16.mxu1 %v5602_v0 }
  0xfc   :  { %4829 = vmatprep.subr.bf16.mxu0 %v5602_v0 }
  0xfe   :  { %4808 = vmatpush3.bf16.msra.mxu1 %v5389_v62 }
  0xff   :  { %4830 = vmatpush3.bf16.msra.mxu0 %v5390_v63  ;;  %4809 = vmatprep.subr.bf16.mxu1 %v5602_v0 }
 0x100   :  { %4831 = vmatprep.subr.bf16.mxu0 %v5602_v0 }
 0x102   :  { %4810 = vmatpush3.bf16.msra.mxu1 %v5391_v5 }
 0x103   :  { %4832 = vmatpush3.bf16.msra.mxu0 %v5392_v6  ;;  %4811 = vmatprep.subr.bf16.mxu1 %v5602_v0 }
 0x104   :  { %4857 = vmatprep.subr.bf16.mxu0 %v5602_v0 }
 0x106   :  { %4834 = vmatmul.mubr.msk.bf16.vlgmr.msra.gmra.mrb[8].mxu0 %vm5863_vm14, %v3774_v15  ;;  %4812 = vmatpush3.bf16.msra.mxu1 %v5393_v13 }
 0x107   :  { %4873 = vmatprep.mubr.msk.bf16.mxu0 %vm5603_vm0, %v5602_v0  ;;  %4837 = vmatprep.subr.bf16.mxu1 %v5602_v0 }
 0x108   :  { %4858 = vmatpush3.bf16.msra.mxu0 %v5403_v32 }
 0x109   :  { %4814 = vmatmul.mubr.msk.bf16.vlgmr.msra.gmra.mrb[4].mxu1 %vm5875_vm2, %v3747_v20  ;;  %4859 = vmatprep.subr.bf16.mxu0 %v5602_v0 }
 0x10a   :  { %4838 = vmatpush3.bf16.msra.mxu1 %v5394_v19  ;;  %4853 = vmatprep.mubr.msk.bf16.mxu1 %vm5603_vm0, %v5602_v0 }
 0x10b   :  { %4839 = vmatprep.subr.bf16.mxu1 %v5602_v0 }
 0x10c   :  { %4860 = vmatpush3.bf16.msra.mxu0 %v5405_v35 }
 0x10d   :  { %4861 = vmatprep.subr.bf16.mxu0 %v5602_v0 }
 0x10e   :  { %4840 = vmatpush3.bf16.msra.mxu1 %v5395_v22 }
 0x10f   :  { %4841 = vmatprep.subr.bf16.mxu1 %v5602_v0 }
 0x110   :  { %4862 = vmatpush3.bf16.msra.mxu0 %v5407_v37  ;;  %v5419_v37 = vld [vmem:[%s7009_s3 + $0x180] sm:$0xff]  }
 0x111   :  { %4863 = vmatprep.subr.bf16.mxu0 %v5602_v0 }
 0x112   :  { %4842 = vmatpush3.bf16.msra.mxu1 %v5396_v23 }
 0x113   :  { %4843 = vmatprep.subr.bf16.mxu1 %v5602_v0 }
 0x114   :  { %4864 = vmatpush3.bf16.msra.mxu0 %v5409_v39 }
 0x115   :  { %4865 = vmatprep.subr.bf16.mxu0 %v5602_v0 }
 0x116   :  { %4844 = vmatpush3.bf16.msra.mxu1 %v5397_v24 }
 0x117   :  { %4845 = vmatprep.subr.bf16.mxu1 %v5602_v0 }
 0x118   :  { %4866 = vmatpush3.bf16.msra.mxu0 %v5411_v41 }
 0x119   :  { %4867 = vmatprep.subr.bf16.mxu0 %v5602_v0 }
 0x11a   :  { %4846 = vmatpush3.bf16.msra.mxu1 %v5398_v25 }
 0x11b   :  { %4847 = vmatprep.subr.bf16.mxu1 %v5602_v0 }
 0x11c   :  { %4868 = vmatpush3.bf16.msra.mxu0 %v5413_v43 }
 0x11d   :  { %4869 = vmatprep.subr.bf16.mxu0 %v5602_v0 }
 0x11e   :  { %4848 = vmatpush3.bf16.msra.mxu1 %v5399_v26 }
 0x11f   :  { %4849 = vmatprep.subr.bf16.mxu1 %v5602_v0 }
 0x120   :  { %4870 = vmatpush3.bf16.msra.mxu0 %v5415_v45 }
 0x121   :  { %4871 = vmatprep.subr.bf16.mxu0 %v5602_v0 }
 0x122   :  { %4850 = vmatpush3.bf16.msra.mxu1 %v5400_v28 }
 0x123   :  { %4851 = vmatprep.subr.bf16.mxu1 %v5602_v0 }
 0x124   :  { %4872 = vmatpush3.bf16.msra.mxu0 %v5417_v48 }
 0x125   :  { %4897 = vmatprep.subr.bf16.mxu0 %v5602_v0 }
 0x126   :  { %4852 = vmatpush3.bf16.msra.mxu1 %v5401_v29  ;;  %v5418_v29 = vld [vmem:[%s7009_s3 + $0x200] sm:$0xff]  }
 0x127   :  { %4877 = vmatprep.subr.bf16.mxu1 %v5602_v0 }
 0x129   :  { %4854 = vmatmul.mubr.msk.bf16.vlgmr.msra.gmra.mrb[8].mxu1 %vm5737_vm4, %v3801_v53 }
 0x12a   :  { %4893 = vmatprep.mubr.msk.bf16.mxu1 %vm5603_vm0, %v5602_v0  ;;  %4878 = vmatpush3.bf16.msra.mxu1 %v5402_v31 }
 0x12b   :  { %4879 = vmatprep.subr.bf16.mxu1 %v5602_v0 }
 0x12e   :  { %4880 = vmatpush3.bf16.msra.mxu1 %v5404_v34 }
 0x12f   :  { %4881 = vmatprep.subr.bf16.mxu1 %v5602_v0 }
 0x132   :  { %4882 = vmatpush3.bf16.msra.mxu1 %v5406_v36 }
 0x133   :  { %4883 = vmatprep.subr.bf16.mxu1 %v5602_v0 }
 0x136   :  { %4884 = vmatpush3.bf16.msra.mxu1 %v5408_v38 }
 0x137   :  { %4885 = vmatprep.subr.bf16.mxu1 %v5602_v0 }
 0x13a   :  { %4886 = vmatpush3.bf16.msra.mxu1 %v5410_v40 }
 0x13b   :  { %4887 = vmatprep.subr.bf16.mxu1 %v5602_v0 }
 0x13e   :  { %4888 = vmatpush3.bf16.msra.mxu1 %v5412_v42 }
 0x13f   :  { %4889 = vmatprep.subr.bf16.mxu1 %v5602_v0 }
 0x142   :  { %4890 = vmatpush3.bf16.msra.mxu1 %v5414_v44  ;;  %v5420_v44 = vld [vmem:[%s7009_s3 + $0x208] sm:$0xff]  }
 0x143   :  { %4891 = vmatprep.subr.bf16.mxu1 %v5602_v0 }
 0x146   :  { %4892 = vmatpush3.bf16.msra.mxu1 %v5416_v46 }
 0x147   :  { %4917 = vmatprep.subr.bf16.mxu1 %v5602_v0 }
 0x1b9   :  { %v378_v49 = vpop.f32.mrb[4].mxu0 }
 0x1ba   :  { %v4795_v50 = vpop.f32.mrb[5].mxu0 }
 0x1bb   :  { %v381_v51 = vpop.f32.mrb[6].mxu0  ;;  %v5421_v50 = vld [vmem:[%s7009_s3 + $0x188] sm:$0xff]  }
 0x1bc   :  { %v4796_v52 = vpop.f32.mrb[7].mxu0  ;;  %v289_v53 = vpop.f32.mrb[0].mxu1 }
 0x1bd   :  { %v379_v54 = vadd.f32 %v378_v49, %v289_v53  ;;  %v4775_v55 = vpop.f32.mrb[1].mxu1  ;;  %v5423_v52 = vld [vmem:[%s7009_s3 + $0x190] sm:$0xff]   ;;  %v5424_v53 = vld [vmem:[%s7009_s3 + $0x218] sm:$0xff]  }
 0x1be   :  { %v292_v56 = vpop.f32.mrb[2].mxu1  ;;  %v5426_v55 = vld [vmem:[%s7009_s3 + $0x220] sm:$0xff]  }
 0x1bf   :  { %v382_v57 = vadd.f32 %v381_v51, %v292_v56  ;;  %v4776_v58 = vpop.f32.mrb[3].mxu1  ;;  %v5422_v51 = vld [vmem:[%s7009_s3 + $0x210] sm:$0xff]   ;;  %v5427_v56 = vld [vmem:[%s7009_s3 + $0x1a0] sm:$0xff]  }
 0x1c0   :  { %v5429_v58 = vld [vmem:[%s7009_s3 + $0x1a8] sm:$0xff]  }
 0x1d9   :  { %v608_v59 = vpop.f32.mrb[8].mxu0 }
 0x1da   :  { %v4835_v60 = vpop.f32.mrb[9].mxu0 }
 0x1db   :  { %v611_v61 = vpop.f32.mrb[10].mxu0  ;;  %v5431_v60 = vld [vmem:[%s7009_s3 + $0x1b0] sm:$0xff]  }
 0x1dc   :  { %v4836_v62 = vpop.f32.mrb[11].mxu0  ;;  %v492_v63 = vpop.f32.mrb[4].mxu1 }
 0x1dd   :  { %v499_v1 = vadd.f32 %v492_v63, %v379_v54  ;;  %v4815_v2 = vpop.f32.mrb[5].mxu1  ;;  %v5425_v54 = vld [vmem:[%s7009_s3 + $0x198] sm:$0xff]   ;;  %v5434_v63 = vld [vmem:[%s7009_s3 + $0x240] sm:$0xff]  }
 0x1de   :  { %v495_v3 = vpop.f32.mrb[6].mxu1  ;;  %v5433_v62 = vld [vmem:[%s7009_s3 + $0x1b8] sm:$0xff]   ;;  %v5436_v2 = vld [vmem:[%s7009_s3 + $0x250] sm:$0xff]  }
 0x1df   :  { %v500_v4 = vadd.f32 %v495_v3, %v382_v57  ;;  %v4816_v5 = vpop.f32.mrb[7].mxu1  ;;  %v615_v6 = vadd.f32 %v608_v59, %v499_v1  ;;  %v5428_v57 = vld [vmem:[%s7009_s3 + $0x228] sm:$0xff]   ;;  %v5430_v59 = vld [vmem:[%s7009_s3 + $0x230] sm:$0xff]   ;;  %v5437_v3 = vld [vmem:[%s7009_s3 + $0x258] sm:$0xff]  }
 0x1e0   :  { %v5435_v1 = vld [vmem:[%s7009_s3 + $0x248] sm:$0xff]  }
 0x1e1   :  { %v616_v7 = vadd.f32 %v611_v61, %v500_v4  ;;  %v5432_v61 = vld [vmem:[%s7009_s3 + $0x238] sm:$0xff]   ;;  %v5438_v4 = vld [vmem:[%s7009_s3 + $0x260] sm:$0xff]   ;;  %v5439_v5 = vld [vmem:[%s7009_s3 + $0x268] sm:$0xff]  }
 0x1fc   :  { %v724_v8 = vpop.f32.mrb[8].mxu1 }
 0x1fd   :  { %v731_v10 = vadd.f32 %v724_v8, %v615_v6  ;;  %v4855_v11 = vpop.f32.mrb[9].mxu1  ;;  %v5440_v6 = vld [vmem:[%s7009_s3 + $0x270] sm:$0xff]   ;;  %v5442_v8 = vld [vmem:[%s7009_s3 + $0x300] sm:$0xff]  }
 0x1fe   :  { %v727_v12 = vpop.f32.mrb[10].mxu1  ;;  %v5445_v11 = vld [vmem:[%s7009_s3 + $0x288] sm:$0xff]  }
 0x1ff   :  { %v740_v13 = vadd.f32 %v3803_v9, %v731_v10  ;;  %v732_v15 = vadd.f32 %v727_v12, %v616_v7  ;;  %v4856_v16 = vpop.f32.mrb[11].mxu1  ;;  %v5441_v7 = vld [vmem:[%s7009_s3 + $0x278] sm:$0xff]   ;;  %v5444_v10 = vld [vmem:[%s7009_s3 + $0x308] sm:$0xff]   ;;  %v5446_v12 = vld [vmem:[%s7009_s3 + $0x310] sm:$0xff]  }
 0x200   :  { %v5449_v16 = vld [vmem:[%s7009_s3 + $0x298] sm:$0xff]  }
 0x201   :  { %v742_v17 = vmax.f32 %v740_v13, 0.0  ;;  %v741_v19 = vadd.f32 %v3803_v9, %v732_v15  ;;  %v5443_v9 = vld [vmem:[%s7009_s3 + $0x280] sm:$0xff]   ;;  %v5447_v13 = vld [vmem:[%s7009_s3 + $0x290] sm:$0xff]   ;;  %v5448_v15 = vld [vmem:[%s7009_s3 + $0x318] sm:$0xff]  }
 0x203   :  { %v743_v20 = vmax.f32 %v741_v19, 0.0  ;;  %v762_v22 = vrot.slane %v742_v17, 6  ;;  %v1079_v23 = vrot.slane %v742_v17, 1  ;;  %v964_v31 = vrot.slane %v742_v17, 7  ;;  %v5451_v19 = vld [vmem:[%s7009_s3 + $0x2a0] sm:$0xff]  }
 0x204   :  { %v1194_v32 = vrot.slane %v742_v17, 2 }
 0x205   :  { %v763_v24 = vrot.slane %v743_v20, 6  ;;  %v965_v25 = vrot.slane %v743_v20, 7  ;;  %v1080_v26 = vrot.slane %v743_v20, 1  ;;  %v1195_v28 = vrot.slane %v743_v20, 2 }
 0x206   :  { %v744_v34 = vpack.c.bf16 %v743_v20, %v742_v17  ;;  %v5450_v17 = vld [vmem:[%s7009_s3 + $0x320] sm:$0xff]   ;;  %v5452_v20 = vld [vmem:[%s7009_s3 + $0x328] sm:$0xff]  }
 0x207   :  { %v764_v35 = vsel %vm185_vm5, %v762_v22, %v763_v24  ;;  %v765_v36 = vsel %vm185_vm5, %v763_v24, %v762_v22  ;;  %v1081_v38 = vsel %vm503_vm10, %v1079_v23, %v1080_v26  ;;  %v1082_v39 = vsel %vm503_vm10, %v1080_v26, %v1079_v23  ;;  %v5453_v22 = vld [vmem:[%s7009_s3 + $0x2a8] sm:$0xff]   ;;  %v5454_v23 = vld [vmem:[%s7009_s3 + $0x330] sm:$0xff]   ;;  %v5457_v26 = vld [vmem:[%s7009_s3 + $0x2b8] sm:$0xff]  }
 0x208   :  { %4894 = vmatmul.mubr.bf16.vlgmr.msra.gmra.mrb[12].mxu1 %v744_v34  ;;  %v3845_v40 = vpack.c.bf16 %v764_v35, %v765_v36  ;;  %v3907_v41 = vpack.c.bf16 %v1082_v39, %v1081_v38  ;;  %v966_v42 = vsel %vm387_vm13, %v964_v31, %v965_v25  ;;  %v967_v43 = vsel %vm387_vm13, %v965_v25, %v964_v31  ;;  %v5455_v24 = vld [vmem:[%s7009_s3 + $0x2b0] sm:$0xff]   ;;  %v5456_v25 = vld [vmem:[%s7009_s3 + $0x338] sm:$0xff]  }
 0x209   :  { %4918 = vmatpush3.bf16.msra.mxu1 %v5418_v29  ;;  %4933 = vmatprep.mubr.msk.bf16.mxu1 %vm5603_vm0, %v5602_v0  ;;  %v3880_v45 = vpack.c.bf16 %v966_v42, %v967_v43  ;;  %v6017_v46 = vsel %vm619_vm8, %v1194_v32, %v1195_v28  ;;  %v6021_v48 = vsel %vm619_vm8, %v1195_v28, %v1194_v32 }
 0x20a   :  { %4874 = vmatmul.mubr.msk.bf16.vlgmr.msra.gmra.mrb[12].mxu0 %vm5771_vm9, %v3845_v40  ;;  %4919 = vmatprep.subr.bf16.mxu1 %v5602_v0  ;;  %v3934_v49 = vpack.c.bf16 %v6021_v48, %v6017_v46 }
 0x20b   :  { %4898 = vmatpush3.bf16.msra.mxu0 %v5419_v37  ;;  %4913 = vmatprep.mubr.msk.bf16.mxu0 %vm5603_vm0, %v5602_v0 }
 0x20c   :  { %4899 = vmatprep.subr.bf16.mxu0 %v5602_v0 }
 0x20d   :  { %4920 = vmatpush3.bf16.msra.mxu1 %v5420_v44 }
 0x20e   :  { %4921 = vmatprep.subr.bf16.mxu1 %v5602_v0 }
 0x20f   :  { %4900 = vmatpush3.bf16.msra.mxu0 %v5421_v50 }
 0x210   :  { %4901 = vmatprep.subr.bf16.mxu0 %v5602_v0 }
 0x211   :  { %4922 = vmatpush3.bf16.msra.mxu1 %v5422_v51 }
 0x212   :  { %4923 = vmatprep.subr.bf16.mxu1 %v5602_v0 }
 0x213   :  { %4902 = vmatpush3.bf16.msra.mxu0 %v5423_v52 }
 0x214   :  { %4903 = vmatprep.subr.bf16.mxu0 %v5602_v0 }
 0x215   :  { %4924 = vmatpush3.bf16.msra.mxu1 %v5424_v53 }
 0x216   :  { %4925 = vmatprep.subr.bf16.mxu1 %v5602_v0 }
 0x217   :  { %4904 = vmatpush3.bf16.msra.mxu0 %v5425_v54  ;;  %v3937_v54 = vld [vmem:[%s7011_s4 + $0x1] ss:$0 sm:$0xff] }
 0x218   :  { %4905 = vmatprep.subr.bf16.mxu0 %v5602_v0 }
 0x219   :  { %4926 = vmatpush3.bf16.msra.mxu1 %v5426_v55 }
 0x21a   :  { %4927 = vmatprep.subr.bf16.mxu1 %v5602_v0 }
 0x21b   :  { %4906 = vmatpush3.bf16.msra.mxu0 %v5427_v56 }
 0x21c   :  { %4907 = vmatprep.subr.bf16.mxu0 %v5602_v0 }
 0x21d   :  { %4928 = vmatpush3.bf16.msra.mxu1 %v5428_v57 }
 0x21e   :  { %4929 = vmatprep.subr.bf16.mxu1 %v5602_v0 }
 0x21f   :  { %4908 = vmatpush3.bf16.msra.mxu0 %v5429_v58 }
 0x220   :  { %4909 = vmatprep.subr.bf16.mxu0 %v5602_v0 }
 0x221   :  { %4930 = vmatpush3.bf16.msra.mxu1 %v5430_v59 }
 0x222   :  { %4931 = vmatprep.subr.bf16.mxu1 %v5602_v0 }
 0x223   :  { %4910 = vmatpush3.bf16.msra.mxu0 %v5431_v60 }
 0x224   :  { %4911 = vmatprep.subr.bf16.mxu0 %v5602_v0 }
 0x225   :  { %4932 = vmatpush3.bf16.msra.mxu1 %v5432_v61 }
 0x226   :  { %4957 = vmatprep.subr.bf16.mxu1 %v5602_v0 }
 0x227   :  { %4912 = vmatpush3.bf16.msra.mxu0 %v5433_v62 }
 0x228   :  { %4934 = vmatmul.mubr.msk.bf16.vlgmr.msra.gmra.mrb[16].mxu1 %vm5863_vm14, %v3907_v41  ;;  %4937 = vmatprep.subr.bf16.mxu0 %v5602_v0 }
 0x229   :  { %4973 = vmatprep.mubr.msk.bf16.mxu1 %vm5603_vm0, %v5602_v0  ;;  %4958 = vmatpush3.bf16.msra.mxu1 %v5443_v9 }
 0x22a   :  { %4914 = vmatmul.mubr.msk.bf16.vlgmr.msra.gmra.mrb[16].mxu0 %vm5875_vm2, %v3880_v45  ;;  %4959 = vmatprep.subr.bf16.mxu1 %v5602_v0 }
 0x22b   :  { %4938 = vmatpush3.bf16.msra.mxu0 %v5434_v63  ;;  %4953 = vmatprep.mubr.msk.bf16.mxu0 %vm5603_vm0, %v5602_v0 }
 0x22c   :  { %4939 = vmatprep.subr.bf16.mxu0 %v5602_v0 }
 0x22d   :  { %4960 = vmatpush3.bf16.msra.mxu1 %v5445_v11 }
 0x22e   :  { %4961 = vmatprep.subr.bf16.mxu1 %v5602_v0 }
 0x22f   :  { %4940 = vmatpush3.bf16.msra.mxu0 %v5435_v1 }
 0x230   :  { %4941 = vmatprep.subr.bf16.mxu0 %v5602_v0 }
 0x231   :  { %4962 = vmatpush3.bf16.msra.mxu1 %v5447_v13  ;;  %v5460_v13 = vld [vmem:[%s7009_s3 + $0x348] sm:$0xff]  }
 0x232   :  { %4963 = vmatprep.subr.bf16.mxu1 %v5602_v0 }
 0x233   :  { %4942 = vmatpush3.bf16.msra.mxu0 %v5436_v2 }
 0x234   :  { %4943 = vmatprep.subr.bf16.mxu0 %v5602_v0 }
 0x235   :  { %4964 = vmatpush3.bf16.msra.mxu1 %v5449_v16 }
 0x236   :  { %4965 = vmatprep.subr.bf16.mxu1 %v5602_v0 }
 0x237   :  { %4944 = vmatpush3.bf16.msra.mxu0 %v5437_v3 }
 0x238   :  { %4945 = vmatprep.subr.bf16.mxu0 %v5602_v0 }
 0x239   :  { %4966 = vmatpush3.bf16.msra.mxu1 %v5451_v19  ;;  %v5461_v19 = vld [vmem:[%s7009_s3 + $0x2c8] sm:$0xff]  }
 0x23a   :  { %4967 = vmatprep.subr.bf16.mxu1 %v5602_v0 }
 0x23b   :  { %4946 = vmatpush3.bf16.msra.mxu0 %v5438_v4 }
 0x23c   :  { %4947 = vmatprep.subr.bf16.mxu0 %v5602_v0 }
 0x23d   :  { %4968 = vmatpush3.bf16.msra.mxu1 %v5453_v22  ;;  %v5463_v22 = vld [vmem:[%s7009_s3 + $0x2d0] sm:$0xff]  }
 0x23e   :  { %4969 = vmatprep.subr.bf16.mxu1 %v5602_v0 }
 0x23f   :  { %4948 = vmatpush3.bf16.msra.mxu0 %v5439_v5  ;;  %v5458_v5 = vld [vmem:[%s7009_s3 + $0x340] sm:$0xff]  }
 0x240   :  { %4949 = vmatprep.subr.bf16.mxu0 %v5602_v0 }
 0x241   :  { %4970 = vmatpush3.bf16.msra.mxu1 %v5455_v24  ;;  %v5465_v24 = vld [vmem:[%s7009_s3 + $0x2d8] sm:$0xff]  }
 0x242   :  { %4971 = vmatprep.subr.bf16.mxu1 %v5602_v0 }
 0x243   :  { %4950 = vmatpush3.bf16.msra.mxu0 %v5440_v6 }
 0x244   :  { %4951 = vmatprep.subr.bf16.mxu0 %v5602_v0 }
 0x245   :  { %4972 = vmatpush3.bf16.msra.mxu1 %v5457_v26  ;;  %v5467_v26 = vld [vmem:[%s7009_s3 + $0x2e0] sm:$0xff]  }
 0x246   :  { %4997 = vmatprep.subr.bf16.mxu1 %v5602_v0 }
 0x247   :  { %4952 = vmatpush3.bf16.msra.mxu0 %v5441_v7 }
 0x248   :  { %4977 = vmatprep.subr.bf16.mxu0 %v5602_v0 }
 0x24a   :  { %4954 = vmatmul.mubr.msk.bf16.vlgmr.msra.gmra.mrb[20].mxu0 %vm5737_vm4, %v3934_v49 }
 0x24b   :  { %4993 = vmatprep.mubr.msk.bf16.mxu0 %vm5603_vm0, %v5602_v0  ;;  %4978 = vmatpush3.bf16.msra.mxu0 %v5442_v8 }
 0x24c   :  { %4979 = vmatprep.subr.bf16.mxu0 %v5602_v0 }
 0x24f   :  { %4980 = vmatpush3.bf16.msra.mxu0 %v5444_v10  ;;  %v5459_v10 = vld [vmem:[%s7009_s3 + $0x2c0] sm:$0xff]  }
 0x250   :  { %4981 = vmatprep.subr.bf16.mxu0 %v5602_v0 }
 0x253   :  { %4982 = vmatpush3.bf16.msra.mxu0 %v5446_v12 }
 0x254   :  { %4983 = vmatprep.subr.bf16.mxu0 %v5602_v0 }
 0x257   :  { %4984 = vmatpush3.bf16.msra.mxu0 %v5448_v15 }
 0x258   :  { %4985 = vmatprep.subr.bf16.mxu0 %v5602_v0 }
 0x25b   :  { %4986 = vmatpush3.bf16.msra.mxu0 %v5450_v17 }
 0x25c   :  { %4987 = vmatprep.subr.bf16.mxu0 %v5602_v0 }
 0x25f   :  { %4988 = vmatpush3.bf16.msra.mxu0 %v5452_v20  ;;  %v5462_v20 = vld [vmem:[%s7009_s3 + $0x350] sm:$0xff]  }
 0x260   :  { %4989 = vmatprep.subr.bf16.mxu0 %v5602_v0 }
 0x263   :  { %4990 = vmatpush3.bf16.msra.mxu0 %v5454_v23  ;;  %v5464_v23 = vld [vmem:[%s7009_s3 + $0x358] sm:$0xff]  }
 0x264   :  { %4991 = vmatprep.subr.bf16.mxu0 %v5602_v0 }
 0x267   :  { %4992 = vmatpush3.bf16.msra.mxu0 %v5456_v25  ;;  %v5466_v25 = vld [vmem:[%s7009_s3 + $0x360] sm:$0xff]  }
 0x268   :  { %5017 = vmatprep.subr.bf16.mxu0 %v5602_v0 }
 0x2db   :  { %v957_v28 = vpop.f32.mrb[12].mxu1 }
 0x2dc   :  { %v4895_v29 = vpop.f32.mrb[13].mxu1 }
 0x2dd   :  { %v960_v31 = vpop.f32.mrb[14].mxu1  ;;  %v868_v32 = vpop.f32.mrb[12].mxu0  ;;  %v5469_v29 = vld [vmem:[%s7009_s3 + $0x2e8] sm:$0xff]  }
 0x2de   :  { %v958_v34 = vadd.f32 %v957_v28, %v868_v32  ;;  %v4896_v35 = vpop.f32.mrb[15].mxu1  ;;  %v4875_v36 = vpop.f32.mrb[13].mxu0  ;;  %v5468_v28 = vld [vmem:[%s7009_s3 + $0x368] sm:$0xff]  }
 0x2df   :  { %v871_v37 = vpop.f32.mrb[14].mxu0  ;;  %v5472_v35 = vld [vmem:[%s7009_s3 + $0x378] sm:$0xff]  }
 0x2e0   :  { %v961_v38 = vadd.f32 %v960_v31, %v871_v37  ;;  %v4876_v39 = vpop.f32.mrb[15].mxu0  ;;  %v5470_v31 = vld [vmem:[%s7009_s3 + $0x370] sm:$0xff]  }
 0x2fb   :  { %v1185_v40 = vpop.f32.mrb[16].mxu1 }
 0x2fc   :  { %v4935_v41 = vpop.f32.mrb[17].mxu1 }
 0x2fd   :  { %v1188_v42 = vpop.f32.mrb[18].mxu1  ;;  %v1070_v43 = vpop.f32.mrb[16].mxu0 }
 0x2fe   :  { %v1077_v44 = vadd.f32 %v1070_v43, %v958_v34  ;;  %v4936_v45 = vpop.f32.mrb[19].mxu1  ;;  %v4915_v46 = vpop.f32.mrb[17].mxu0  ;;  %v5471_v34 = vld [vmem:[%s7009_s3 + $0x2f0] sm:$0xff]  }
 0x2ff   :  { %v1073_v48 = vpop.f32.mrb[18].mxu0  ;;  %v5474_v45 = vld [vmem:[%s7009_s3 + $0x380] sm:$0xff]  }
 0x300   :  { %v1078_v49 = vadd.f32 %v1073_v48, %v961_v38  ;;  %v4916_v50 = vpop.f32.mrb[19].mxu0  ;;  %v1192_v51 = vadd.f32 %v1185_v40, %v1077_v44  ;;  %v5473_v40 = vld [vmem:[%s7009_s3 + $0x2f8] sm:$0xff]   ;;  %v5475_v48 = vld [vmem:[%s7009_s3 + $0x388] sm:$0xff]  }
 0x301   :  { %v5477_v50 = vld [vmem:[%s7009_s3 + $0x398] sm:$0xff]  }
 0x302   :  { %v1193_v52 = vadd.f32 %v1188_v42, %v1078_v49  ;;  %v5476_v49 = vld [vmem:[%s7009_s3 + $0x390] sm:$0xff]  }
 0x31d   :  { %v1300_v53 = vpop.f32.mrb[20].mxu0 }
 0x31e   :  { %v1307_v55 = vadd.f32 %v1300_v53, %v1192_v51  ;;  %v4955_v56 = vpop.f32.mrb[21].mxu0  ;;  %v5478_v51 = vld [vmem:[%s7009_s3 + $0x3a0] sm:$0xff]   ;;  %v5480_v53 = vld [vmem:[%s7009_s3 + $0x3b0] sm:$0xff]  }
 0x31f   :  { %v1303_v57 = vpop.f32.mrb[22].mxu0  ;;  %v5483_v56 = vld [vmem:[%s7009_s3 + $0x3c0] sm:$0xff]  }
 0x320   :  { %v1317_v58 = vadd.f32 %v3937_v54, %v1307_v55  ;;  %v1308_v59 = vadd.f32 %v1303_v57, %v1193_v52  ;;  %v4956_v60 = vpop.f32.mrb[23].mxu0  ;;  %v5479_v52 = vld [vmem:[%s7009_s3 + $0x3a8] sm:$0xff]   ;;  %v5482_v55 = vld [vmem:[%s7009_s3 + $0x440] sm:$0xff]  }
 0x321   :  { %v5484_v57 = vld [vmem:[%s7009_s3 + $0x448] sm:$0xff]   ;;  %v5487_v60 = vld [vmem:[%s7009_s3 + $0x3d0] sm:$0xff]  }
 0x322   :  { %v1319_v61 = vmul.f32 0.3, %v1317_v58  ;;  %v1318_v62 = vadd.f32 %v3937_v54, %v1308_v59  ;;  %v5481_v54 = vld [vmem:[%s7009_s3 + $0x3b8] sm:$0xff]   ;;  %v5485_v58 = vld [vmem:[%s7009_s3 + $0x3c8] sm:$0xff]   ;;  %v5486_v59 = vld [vmem:[%s7009_s3 + $0x450] sm:$0xff]  }
 0x324   :  { %v6199_v63 = vadd.f32 %v1319_v61, %v5744_v30  ;;  %v1320_v1 = vmul.f32 0.3, %v1318_v62  ;;  %v5488_v61 = vld [vmem:[%s7009_s3 + $0x458] sm:$0xff]  }
 0x325   :  { %v5489_v62 = vld [vmem:[%s7009_s3 + $0x3d8] sm:$0xff]  }
 0x326   :  { %v6202_v2 = vmax.f32 %v6199_v63, 0.0  ;;  %v6205_v3 = vadd.f32 %v1320_v1, %v5746_v33  ;;  %v5490_v1 = vld [vmem:[%s7009_s3 + $0x460] sm:$0xff]  }
 0x328   :  { %v6208_v4 = vmax.f32 %v6205_v3, 0.0  ;;  %v1343_v30 = vrot.slane %v6202_v2, 6  ;;  %v1775_v11 = vrot.slane %v6202_v2, 2  ;;  %v1660_v36 = vrot.slane %v6202_v2, 1 }
 0x329   :  { %v1545_v41 = vrot.slane %v6202_v2, 7 }
 0x32a   :  { %v1325_v6 = vpack.c.bf16 %v6208_v4, %v6202_v2  ;;  %v1344_v7 = vrot.slane %v6208_v4, 6  ;;  %v1776_v8 = vrot.slane %v6208_v4, 2  ;;  %v1661_v32 = vrot.slane %v6208_v4, 1  ;;  %v5491_v2 = vld [vmem:[%s7009_s3 + $0x3e0] sm:$0xff]  }
 0x32b   :  { %v1546_v37 = vrot.slane %v6208_v4, 7  ;;  %v5492_v4 = vld [vmem:[%s7009_s3 + $0x468] sm:$0xff]  }
 0x32c   :  { %4994 = vmatmul.mubr.bf16.vlgmr.msra.gmra.mrb[24].mxu0 %v1325_v6  ;;  %v1345_v33 = vsel %vm185_vm5, %v1343_v30, %v1344_v7  ;;  %v1346_v9 = vsel %vm185_vm5, %v1344_v7, %v1343_v30  ;;  %v6234_v15 = vsel %vm619_vm8, %v1775_v11, %v1776_v8  ;;  %v6238_v16 = vsel %vm619_vm8, %v1776_v8, %v1775_v11  ;;  %v5494_v6 = vld [vmem:[%s7009_s3 + $0x470] sm:$0xff]   ;;  %v5496_v7 = vld [vmem:[%s7009_s3 + $0x478] sm:$0xff]  }
 0x32d   :  { %5018 = vmatpush3.bf16.msra.mxu0 %v5458_v5  ;;  %v3979_v12 = vpack.c.bf16 %v1345_v33, %v1346_v9  ;;  %5033 = vmatprep.mubr.msk.bf16.mxu0 %vm5603_vm0, %v5602_v0  ;;  %v4068_v17 = vpack.c.bf16 %v6238_v16, %v6234_v15  ;;  %v1662_v38 = vsel %vm503_vm10, %v1660_v36, %v1661_v32  ;;  %v5493_v5 = vld [vmem:[%s7009_s3 + $0x3e8] sm:$0xff]   ;;  %v5495_v30 = vld [vmem:[%s7009_s3 + $0x3f0] sm:$0xff]   ;;  %v5497_v8 = vld [vmem:[%s7009_s3 + $0x3f8] sm:$0xff]  }
 0x32e   :  { %5019 = vmatprep.subr.bf16.mxu0 %v5602_v0  ;;  %v1663_v39 = vsel %vm503_vm10, %v1661_v32, %v1660_v36  ;;  %v1547_v43 = vsel %vm387_vm13, %v1545_v41, %v1546_v37  ;;  %v1548_v44 = vsel %vm387_vm13, %v1546_v37, %v1545_v41  ;;  %v4071_v37 = vld [vmem:[%s7011_s4 + $0x2] ss:$0 sm:$0xff] }
 0x32f   :  { %4974 = vmatmul.mubr.msk.bf16.vlgmr.msra.gmra.mrb[20].mxu1 %vm5771_vm9, %v3979_v12  ;;  %v4041_v42 = vpack.c.bf16 %v1663_v39, %v1662_v38  ;;  %v4014_v46 = vpack.c.bf16 %v1547_v43, %v1548_v44 }
 0x330   :  { %4998 = vmatpush3.bf16.msra.mxu1 %v5459_v10  ;;  %5013 = vmatprep.mubr.msk.bf16.mxu1 %vm5603_vm0, %v5602_v0 }
 0x331   :  { %5020 = vmatpush3.bf16.msra.mxu0 %v5460_v13  ;;  %4999 = vmatprep.subr.bf16.mxu1 %v5602_v0 }
 0x332   :  { %5021 = vmatprep.subr.bf16.mxu0 %v5602_v0 }
 0x334   :  { %5000 = vmatpush3.bf16.msra.mxu1 %v5461_v19 }
 0x335   :  { %5022 = vmatpush3.bf16.msra.mxu0 %v5462_v20  ;;  %5001 = vmatprep.subr.bf16.mxu1 %v5602_v0 }
 0x336   :  { %5023 = vmatprep.subr.bf16.mxu0 %v5602_v0 }
 0x338   :  { %5002 = vmatpush3.bf16.msra.mxu1 %v5463_v22 }
 0x339   :  { %5024 = vmatpush3.bf16.msra.mxu0 %v5464_v23  ;;  %5003 = vmatprep.subr.bf16.mxu1 %v5602_v0 }
 0x33a   :  { %5025 = vmatprep.subr.bf16.mxu0 %v5602_v0 }
 0x33c   :  { %5004 = vmatpush3.bf16.msra.mxu1 %v5465_v24 }
 0x33d   :  { %5026 = vmatpush3.bf16.msra.mxu0 %v5466_v25  ;;  %5005 = vmatprep.subr.bf16.mxu1 %v5602_v0 }
 0x33e   :  { %5027 = vmatprep.subr.bf16.mxu0 %v5602_v0 }
 0x340   :  { %5006 = vmatpush3.bf16.msra.mxu1 %v5467_v26 }
 0x341   :  { %5028 = vmatpush3.bf16.msra.mxu0 %v5468_v28  ;;  %5007 = vmatprep.subr.bf16.mxu1 %v5602_v0 }
 0x342   :  { %5029 = vmatprep.subr.bf16.mxu0 %v5602_v0 }
 0x344   :  { %5008 = vmatpush3.bf16.msra.mxu1 %v5469_v29 }
 0x345   :  { %5030 = vmatpush3.bf16.msra.mxu0 %v5470_v31  ;;  %5009 = vmatprep.subr.bf16.mxu1 %v5602_v0 }
 0x346   :  { %5031 = vmatprep.subr.bf16.mxu0 %v5602_v0 }
 0x348   :  { %5010 = vmatpush3.bf16.msra.mxu1 %v5471_v34 }
 0x349   :  { %5032 = vmatpush3.bf16.msra.mxu0 %v5472_v35  ;;  %5011 = vmatprep.subr.bf16.mxu1 %v5602_v0 }
 0x34a   :  { %5057 = vmatprep.subr.bf16.mxu0 %v5602_v0 }
 0x34c   :  { %5012 = vmatpush3.bf16.msra.mxu1 %v5473_v40  ;;  %5034 = vmatmul.mubr.msk.bf16.vlgmr.msra.gmra.mrb[28].mxu0 %vm5863_vm14, %v4041_v42 }
 0x34d   :  { %5037 = vmatprep.subr.bf16.mxu1 %v5602_v0  ;;  %5073 = vmatprep.mubr.msk.bf16.mxu0 %vm5603_vm0, %v5602_v0 }
 0x34e   :  { %5058 = vmatpush3.bf16.msra.mxu0 %v5483_v56 }
 0x34f   :  { %5014 = vmatmul.mubr.msk.bf16.vlgmr.msra.gmra.mrb[24].mxu1 %vm5875_vm2, %v4014_v46  ;;  %5059 = vmatprep.subr.bf16.mxu0 %v5602_v0 }
 0x350   :  { %5038 = vmatpush3.bf16.msra.mxu1 %v5474_v45  ;;  %5053 = vmatprep.mubr.msk.bf16.mxu1 %vm5603_vm0, %v5602_v0 }
 0x351   :  { %5039 = vmatprep.subr.bf16.mxu1 %v5602_v0 }
 0x352   :  { %5060 = vmatpush3.bf16.msra.mxu0 %v5485_v58 }
 0x353   :  { %5061 = vmatprep.subr.bf16.mxu0 %v5602_v0 }
 0x354   :  { %5040 = vmatpush3.bf16.msra.mxu1 %v5475_v48 }
 0x355   :  { %5041 = vmatprep.subr.bf16.mxu1 %v5602_v0 }
 0x356   :  { %5062 = vmatpush3.bf16.msra.mxu0 %v5487_v60  ;;  %v5499_v60 = vld [vmem:[%s7009_s3 + $0x400] sm:$0xff]  }
 0x357   :  { %5063 = vmatprep.subr.bf16.mxu0 %v5602_v0 }
 0x358   :  { %5042 = vmatpush3.bf16.msra.mxu1 %v5476_v49 }
 0x359   :  { %5043 = vmatprep.subr.bf16.mxu1 %v5602_v0 }
 0x35a   :  { %5064 = vmatpush3.bf16.msra.mxu0 %v5489_v62 }
 0x35b   :  { %5065 = vmatprep.subr.bf16.mxu0 %v5602_v0 }
 0x35c   :  { %5044 = vmatpush3.bf16.msra.mxu1 %v5477_v50 }
 0x35d   :  { %5045 = vmatprep.subr.bf16.mxu1 %v5602_v0 }
 0x35e   :  { %5066 = vmatpush3.bf16.msra.mxu0 %v5491_v2 }
 0x35f   :  { %5067 = vmatprep.subr.bf16.mxu0 %v5602_v0 }
 0x360   :  { %5046 = vmatpush3.bf16.msra.mxu1 %v5478_v51 }
 0x361   :  { %5047 = vmatprep.subr.bf16.mxu1 %v5602_v0 }
 0x362   :  { %5068 = vmatpush3.bf16.msra.mxu0 %v5493_v5 }
 0x363   :  { %5069 = vmatprep.subr.bf16.mxu0 %v5602_v0 }
 0x364   :  { %5048 = vmatpush3.bf16.msra.mxu1 %v5479_v52 }
 0x365   :  { %5049 = vmatprep.subr.bf16.mxu1 %v5602_v0 }
 0x366   :  { %5070 = vmatpush3.bf16.msra.mxu0 %v5495_v30 }
 0x367   :  { %5071 = vmatprep.subr.bf16.mxu0 %v5602_v0 }
 0x368   :  { %5050 = vmatpush3.bf16.msra.mxu1 %v5480_v53 }
 0x369   :  { %5051 = vmatprep.subr.bf16.mxu1 %v5602_v0 }
 0x36a   :  { %5072 = vmatpush3.bf16.msra.mxu0 %v5497_v8 }
 0x36b   :  { %5097 = vmatprep.subr.bf16.mxu0 %v5602_v0 }
 0x36c   :  { %5052 = vmatpush3.bf16.msra.mxu1 %v5481_v54  ;;  %v5498_v54 = vld [vmem:[%s7009_s3 + $0x480] sm:$0xff]  }
 0x36d   :  { %5077 = vmatprep.subr.bf16.mxu1 %v5602_v0 }
 0x36f   :  { %5054 = vmatmul.mubr.msk.bf16.vlgmr.msra.gmra.mrb[28].mxu1 %vm5737_vm4, %v4068_v17 }
 0x370   :  { %5093 = vmatprep.mubr.msk.bf16.mxu1 %vm5603_vm0, %v5602_v0  ;;  %5078 = vmatpush3.bf16.msra.mxu1 %v5482_v55 }
 0x371   :  { %5079 = vmatprep.subr.bf16.mxu1 %v5602_v0 }
 0x374   :  { %5080 = vmatpush3.bf16.msra.mxu1 %v5484_v57 }
 0x375   :  { %5081 = vmatprep.subr.bf16.mxu1 %v5602_v0 }
 0x378   :  { %5082 = vmatpush3.bf16.msra.mxu1 %v5486_v59 }
 0x379   :  { %5083 = vmatprep.subr.bf16.mxu1 %v5602_v0 }
 0x37c   :  { %5084 = vmatpush3.bf16.msra.mxu1 %v5488_v61 }
 0x37d   :  { %5085 = vmatprep.subr.bf16.mxu1 %v5602_v0 }
 0x380   :  { %5086 = vmatpush3.bf16.msra.mxu1 %v5490_v1 }
 0x381   :  { %5087 = vmatprep.subr.bf16.mxu1 %v5602_v0 }
 0x384   :  { %5088 = vmatpush3.bf16.msra.mxu1 %v5492_v4 }
 0x385   :  { %5089 = vmatprep.subr.bf16.mxu1 %v5602_v0 }
 0x388   :  { %5090 = vmatpush3.bf16.msra.mxu1 %v5494_v6  ;;  %v5500_v6 = vld [vmem:[%s7009_s3 + $0x488] sm:$0xff]  }
 0x389   :  { %5091 = vmatprep.subr.bf16.mxu1 %v5602_v0 }
 0x38c   :  { %5092 = vmatpush3.bf16.msra.mxu1 %v5496_v7 }
 0x38d   :  { %5117 = vmatprep.subr.bf16.mxu1 %v5602_v0 }
 0x3ff   :  { %v1538_v33 = vpop.f32.mrb[24].mxu0 }
 0x400   :  { %v4995_v9 = vpop.f32.mrb[25].mxu0 }
 0x401   :  { %v1541_v10 = vpop.f32.mrb[26].mxu0  ;;  %v5501_v9 = vld [vmem:[%s7009_s3 + $0x408] sm:$0xff]  }
 0x402   :  { %v1449_v11 = vpop.f32.mrb[20].mxu1  ;;  %v4996_v12 = vpop.f32.mrb[27].mxu0 }
 0x403   :  { %v1539_v13 = vadd.f32 %v1538_v33, %v1449_v11  ;;  %v4975_v15 = vpop.f32.mrb[21].mxu1  ;;  %v5503_v11 = vld [vmem:[%s7009_s3 + $0x410] sm:$0xff]   ;;  %v5504_v12 = vld [vmem:[%s7009_s3 + $0x498] sm:$0xff]  }
 0x404   :  { %v1452_v16 = vpop.f32.mrb[22].mxu1  ;;  %v5506_v15 = vld [vmem:[%s7009_s3 + $0x4a0] sm:$0xff]  }
 0x405   :  { %v1542_v17 = vadd.f32 %v1541_v10, %v1452_v16  ;;  %v4976_v19 = vpop.f32.mrb[23].mxu1  ;;  %v5502_v10 = vld [vmem:[%s7009_s3 + $0x490] sm:$0xff]   ;;  %v5507_v16 = vld [vmem:[%s7009_s3 + $0x420] sm:$0xff]  }
 0x406   :  { %v5509_v19 = vld [vmem:[%s7009_s3 + $0x428] sm:$0xff]  }
 0x41f   :  { %v1766_v20 = vpop.f32.mrb[28].mxu0 }
 0x420   :  { %v5035_v22 = vpop.f32.mrb[29].mxu0 }
 0x421   :  { %v1769_v23 = vpop.f32.mrb[30].mxu0  ;;  %v5511_v22 = vld [vmem:[%s7009_s3 + $0x430] sm:$0xff]  }
 0x422   :  { %v1651_v24 = vpop.f32.mrb[24].mxu1  ;;  %v5036_v25 = vpop.f32.mrb[31].mxu0 }
 0x423   :  { %v1658_v26 = vadd.f32 %v1651_v24, %v1539_v13  ;;  %v5015_v28 = vpop.f32.mrb[25].mxu1  ;;  %v5505_v13 = vld [vmem:[%s7009_s3 + $0x418] sm:$0xff]   ;;  %v5514_v25 = vld [vmem:[%s7009_s3 + $0x4c0] sm:$0xff]  }
 0x424   :  { %v1654_v29 = vpop.f32.mrb[26].mxu1  ;;  %v5513_v24 = vld [vmem:[%s7009_s3 + $0x438] sm:$0xff]   ;;  %v5516_v28 = vld [vmem:[%s7009_s3 + $0x4d0] sm:$0xff]  }
 0x425   :  { %v1659_v31 = vadd.f32 %v1654_v29, %v1542_v17  ;;  %v5016_v32 = vpop.f32.mrb[27].mxu1  ;;  %v1773_v34 = vadd.f32 %v1766_v20, %v1658_v26  ;;  %v5508_v17 = vld [vmem:[%s7009_s3 + $0x4a8] sm:$0xff]   ;;  %v5510_v20 = vld [vmem:[%s7009_s3 + $0x4b0] sm:$0xff]   ;;  %v5517_v29 = vld [vmem:[%s7009_s3 + $0x4d8] sm:$0xff]  }
 0x426   :  { %v5515_v26 = vld [vmem:[%s7009_s3 + $0x4c8] sm:$0xff]  }
 0x427   :  { %v1774_v35 = vadd.f32 %v1769_v23, %v1659_v31  ;;  %v5512_v23 = vld [vmem:[%s7009_s3 + $0x4b8] sm:$0xff]   ;;  %v5518_v31 = vld [vmem:[%s7009_s3 + $0x4e0] sm:$0xff]   ;;  %v5519_v32 = vld [vmem:[%s7009_s3 + $0x4e8] sm:$0xff]  }
 0x442   :  { %v1881_v36 = vpop.f32.mrb[28].mxu1 }
 0x443   :  { %v1888_v38 = vadd.f32 %v1881_v36, %v1773_v34  ;;  %v5055_v39 = vpop.f32.mrb[29].mxu1  ;;  %v5520_v34 = vld [vmem:[%s7009_s3 + $0x4f0] sm:$0xff]   ;;  %v5522_v36 = vld [vmem:[%s7009_s3 + $0x580] sm:$0xff]  }
 0x444   :  { %v1884_v40 = vpop.f32.mrb[30].mxu1  ;;  %v5525_v39 = vld [vmem:[%s7009_s3 + $0x508] sm:$0xff]  }
 0x445   :  { %v1898_v41 = vadd.f32 %v4071_v37, %v1888_v38  ;;  %v1889_v42 = vadd.f32 %v1884_v40, %v1774_v35  ;;  %v5056_v43 = vpop.f32.mrb[31].mxu1  ;;  %v5521_v35 = vld [vmem:[%s7009_s3 + $0x4f8] sm:$0xff]   ;;  %v5524_v38 = vld [vmem:[%s7009_s3 + $0x588] sm:$0xff]   ;;  %v5526_v40 = vld [vmem:[%s7009_s3 + $0x590] sm:$0xff]  }
 0x446   :  { %v5529_v43 = vld [vmem:[%s7009_s3 + $0x518] sm:$0xff]  }
 0x447   :  { %v1900_v44 = vmax.f32 %v1898_v41, 0.0  ;;  %v1899_v45 = vadd.f32 %v4071_v37, %v1889_v42  ;;  %v5523_v37 = vld [vmem:[%s7009_s3 + $0x500] sm:$0xff]   ;;  %v5527_v41 = vld [vmem:[%s7009_s3 + $0x510] sm:$0xff]   ;;  %v5528_v42 = vld [vmem:[%s7009_s3 + $0x598] sm:$0xff]  }
 0x449   :  { %v1901_v46 = vmax.f32 %v1899_v45, 0.0  ;;  %v1920_v48 = vrot.slane %v1900_v44, 6  ;;  %v2237_v49 = vrot.slane %v1900_v44, 1  ;;  %v2122_v55 = vrot.slane %v1900_v44, 7  ;;  %v5531_v45 = vld [vmem:[%s7009_s3 + $0x520] sm:$0xff]  }
 0x44a   :  { %v2352_v56 = vrot.slane %v1900_v44, 2 }
 0x44b   :  { %v1921_v50 = vrot.slane %v1901_v46, 6  ;;  %v2123_v51 = vrot.slane %v1901_v46, 7  ;;  %v2238_v52 = vrot.slane %v1901_v46, 1  ;;  %v2353_v53 = vrot.slane %v1901_v46, 2 }
 0x44c   :  { %v1902_v57 = vpack.c.bf16 %v1901_v46, %v1900_v44  ;;  %v5530_v44 = vld [vmem:[%s7009_s3 + $0x5a0] sm:$0xff]   ;;  %v5532_v46 = vld [vmem:[%s7009_s3 + $0x5a8] sm:$0xff]  }
 0x44d   :  { %v1922_v58 = vsel %vm185_vm5, %v1920_v48, %v1921_v50  ;;  %v1923_v59 = vsel %vm185_vm5, %v1921_v50, %v1920_v48  ;;  %v2239_v61 = vsel %vm503_vm10, %v2237_v49, %v2238_v52  ;;  %v2240_v62 = vsel %vm503_vm10, %v2238_v52, %v2237_v49  ;;  %v5533_v48 = vld [vmem:[%s7009_s3 + $0x528] sm:$0xff]   ;;  %v5534_v49 = vld [vmem:[%s7009_s3 + $0x5b0] sm:$0xff]   ;;  %v5537_v52 = vld [vmem:[%s7009_s3 + $0x538] sm:$0xff]  }
 0x44e   :  { %5094 = vmatmul.mubr.bf16.vlgmr.msra.gmra.mrb[32].mxu1 %v1902_v57  ;;  %v4113_v1 = vpack.c.bf16 %v1922_v58, %v1923_v59  ;;  %v4175_v2 = vpack.c.bf16 %v2240_v62, %v2239_v61  ;;  %v2124_v4 = vsel %vm387_vm13, %v2122_v55, %v2123_v51  ;;  %v2125_v5 = vsel %vm387_vm13, %v2123_v51, %v2122_v55  ;;  %v5535_v50 = vld [vmem:[%s7009_s3 + $0x530] sm:$0xff]   ;;  %v5536_v51 = vld [vmem:[%s7009_s3 + $0x5b8] sm:$0xff]  }
 0x44f   :  { %5118 = vmatpush3.bf16.msra.mxu1 %v5498_v54  ;;  %5133 = vmatprep.mubr.msk.bf16.mxu1 %vm5603_vm0, %v5602_v0  ;;  %v4148_v30 = vpack.c.bf16 %v2124_v4, %v2125_v5  ;;  %v6451_v7 = vsel %vm619_vm8, %v2352_v56, %v2353_v53  ;;  %v6455_v8 = vsel %vm619_vm8, %v2353_v53, %v2352_v56 }
 0x450   :  { %5074 = vmatmul.mubr.msk.bf16.vlgmr.msra.gmra.mrb[32].mxu0 %vm5771_vm9, %v4113_v1  ;;  %5119 = vmatprep.subr.bf16.mxu1 %v5602_v0  ;;  %v4202_v33 = vpack.c.bf16 %v6455_v8, %v6451_v7 }
 0x451   :  { %5098 = vmatpush3.bf16.msra.mxu0 %v5499_v60  ;;  %5113 = vmatprep.mubr.msk.bf16.mxu0 %vm5603_vm0, %v5602_v0 }
 0x452   :  { %5099 = vmatprep.subr.bf16.mxu0 %v5602_v0 }
 0x453   :  { %5120 = vmatpush3.bf16.msra.mxu1 %v5500_v6 }
 0x454   :  { %5121 = vmatprep.subr.bf16.mxu1 %v5602_v0 }
 0x455   :  { %5100 = vmatpush3.bf16.msra.mxu0 %v5501_v9 }
 0x456   :  { %5101 = vmatprep.subr.bf16.mxu0 %v5602_v0 }
 0x457   :  { %5122 = vmatpush3.bf16.msra.mxu1 %v5502_v10 }
 0x458   :  { %5123 = vmatprep.subr.bf16.mxu1 %v5602_v0 }
 0x459   :  { %5102 = vmatpush3.bf16.msra.mxu0 %v5503_v11 }
 0x45a   :  { %5103 = vmatprep.subr.bf16.mxu0 %v5602_v0 }
 0x45b   :  { %5124 = vmatpush3.bf16.msra.mxu1 %v5504_v12 }
 0x45c   :  { %5125 = vmatprep.subr.bf16.mxu1 %v5602_v0 }
 0x45d   :  { %5104 = vmatpush3.bf16.msra.mxu0 %v5505_v13  ;;  %v4205_v13 = vld [vmem:[%s7011_s4 + $0x3] ss:$0 sm:$0xff] }
 0x45e   :  { %5105 = vmatprep.subr.bf16.mxu0 %v5602_v0 }
 0x45f   :  { %5126 = vmatpush3.bf16.msra.mxu1 %v5506_v15 }
 0x460   :  { %5127 = vmatprep.subr.bf16.mxu1 %v5602_v0 }
 0x461   :  { %5106 = vmatpush3.bf16.msra.mxu0 %v5507_v16 }
 0x462   :  { %5107 = vmatprep.subr.bf16.mxu0 %v5602_v0 }
 0x463   :  { %5128 = vmatpush3.bf16.msra.mxu1 %v5508_v17 }
 0x464   :  { %5129 = vmatprep.subr.bf16.mxu1 %v5602_v0 }
 0x465   :  { %5108 = vmatpush3.bf16.msra.mxu0 %v5509_v19 }
 0x466   :  { %5109 = vmatprep.subr.bf16.mxu0 %v5602_v0 }
 0x467   :  { %5130 = vmatpush3.bf16.msra.mxu1 %v5510_v20 }
 0x468   :  { %5131 = vmatprep.subr.bf16.mxu1 %v5602_v0 }
 0x469   :  { %5110 = vmatpush3.bf16.msra.mxu0 %v5511_v22 }
 0x46a   :  { %5111 = vmatprep.subr.bf16.mxu0 %v5602_v0 }
 0x46b   :  { %5132 = vmatpush3.bf16.msra.mxu1 %v5512_v23 }
 0x46c   :  { %5157 = vmatprep.subr.bf16.mxu1 %v5602_v0 }
 0x46d   :  { %5112 = vmatpush3.bf16.msra.mxu0 %v5513_v24 }
 0x46e   :  { %5134 = vmatmul.mubr.msk.bf16.vlgmr.msra.gmra.mrb[36].mxu1 %vm5863_vm14, %v4175_v2  ;;  %5137 = vmatprep.subr.bf16.mxu0 %v5602_v0 }
 0x46f   :  { %5173 = vmatprep.mubr.msk.bf16.mxu1 %vm5603_vm0, %v5602_v0  ;;  %5158 = vmatpush3.bf16.msra.mxu1 %v5523_v37 }
 0x470   :  { %5114 = vmatmul.mubr.msk.bf16.vlgmr.msra.gmra.mrb[36].mxu0 %vm5875_vm2, %v4148_v30  ;;  %5159 = vmatprep.subr.bf16.mxu1 %v5602_v0 }
 0x471   :  { %5138 = vmatpush3.bf16.msra.mxu0 %v5514_v25  ;;  %5153 = vmatprep.mubr.msk.bf16.mxu0 %vm5603_vm0, %v5602_v0 }
 0x472   :  { %5139 = vmatprep.subr.bf16.mxu0 %v5602_v0 }
 0x473   :  { %5160 = vmatpush3.bf16.msra.mxu1 %v5525_v39 }
 0x474   :  { %5161 = vmatprep.subr.bf16.mxu1 %v5602_v0 }
 0x475   :  { %5140 = vmatpush3.bf16.msra.mxu0 %v5515_v26 }
 0x476   :  { %5141 = vmatprep.subr.bf16.mxu0 %v5602_v0 }
 0x477   :  { %5162 = vmatpush3.bf16.msra.mxu1 %v5527_v41  ;;  %v5540_v41 = vld [vmem:[%s7009_s3 + $0x5c8] sm:$0xff]  }
 0x478   :  { %5163 = vmatprep.subr.bf16.mxu1 %v5602_v0 }
 0x479   :  { %5142 = vmatpush3.bf16.msra.mxu0 %v5516_v28 }
 0x47a   :  { %5143 = vmatprep.subr.bf16.mxu0 %v5602_v0 }
 0x47b   :  { %5164 = vmatpush3.bf16.msra.mxu1 %v5529_v43 }
 0x47c   :  { %5165 = vmatprep.subr.bf16.mxu1 %v5602_v0 }
 0x47d   :  { %5144 = vmatpush3.bf16.msra.mxu0 %v5517_v29 }
 0x47e   :  { %5145 = vmatprep.subr.bf16.mxu0 %v5602_v0 }
 0x47f   :  { %5166 = vmatpush3.bf16.msra.mxu1 %v5531_v45  ;;  %v5541_v45 = vld [vmem:[%s7009_s3 + $0x548] sm:$0xff]  }
 0x480   :  { %5167 = vmatprep.subr.bf16.mxu1 %v5602_v0 }
 0x481   :  { %5146 = vmatpush3.bf16.msra.mxu0 %v5518_v31 }
 0x482   :  { %5147 = vmatprep.subr.bf16.mxu0 %v5602_v0 }
 0x483   :  { %5168 = vmatpush3.bf16.msra.mxu1 %v5533_v48  ;;  %v5543_v48 = vld [vmem:[%s7009_s3 + $0x550] sm:$0xff]  }
 0x484   :  { %5169 = vmatprep.subr.bf16.mxu1 %v5602_v0 }
 0x485   :  { %5148 = vmatpush3.bf16.msra.mxu0 %v5519_v32  ;;  %v5538_v32 = vld [vmem:[%s7009_s3 + $0x5c0] sm:$0xff]  }
 0x486   :  { %5149 = vmatprep.subr.bf16.mxu0 %v5602_v0 }
 0x487   :  { %5170 = vmatpush3.bf16.msra.mxu1 %v5535_v50  ;;  %v5545_v50 = vld [vmem:[%s7009_s3 + $0x558] sm:$0xff]  }
 0x488   :  { %5171 = vmatprep.subr.bf16.mxu1 %v5602_v0 }
 0x489   :  { %5150 = vmatpush3.bf16.msra.mxu0 %v5520_v34 }
 0x48a   :  { %5151 = vmatprep.subr.bf16.mxu0 %v5602_v0 }
 0x48b   :  { %5172 = vmatpush3.bf16.msra.mxu1 %v5537_v52  ;;  %v5547_v52 = vld [vmem:[%s7009_s3 + $0x560] sm:$0xff]  }
 0x48c   :  { %5197 = vmatprep.subr.bf16.mxu1 %v5602_v0 }
 0x48d   :  { %5152 = vmatpush3.bf16.msra.mxu0 %v5521_v35 }
 0x48e   :  { %5177 = vmatprep.subr.bf16.mxu0 %v5602_v0 }
 0x490   :  { %5154 = vmatmul.mubr.msk.bf16.vlgmr.msra.gmra.mrb[40].mxu0 %vm5737_vm4, %v4202_v33 }
 0x491   :  { %5193 = vmatprep.mubr.msk.bf16.mxu0 %vm5603_vm0, %v5602_v0  ;;  %5178 = vmatpush3.bf16.msra.mxu0 %v5522_v36 }
 0x492   :  { %5179 = vmatprep.subr.bf16.mxu0 %v5602_v0 }
 0x495   :  { %5180 = vmatpush3.bf16.msra.mxu0 %v5524_v38  ;;  %v5539_v38 = vld [vmem:[%s7009_s3 + $0x540] sm:$0xff]  }
 0x496   :  { %5181 = vmatprep.subr.bf16.mxu0 %v5602_v0 }
 0x499   :  { %5182 = vmatpush3.bf16.msra.mxu0 %v5526_v40 }
 0x49a   :  { %5183 = vmatprep.subr.bf16.mxu0 %v5602_v0 }
 0x49d   :  { %5184 = vmatpush3.bf16.msra.mxu0 %v5528_v42 }
 0x49e   :  { %5185 = vmatprep.subr.bf16.mxu0 %v5602_v0 }
 0x4a1   :  { %5186 = vmatpush3.bf16.msra.mxu0 %v5530_v44 }
 0x4a2   :  { %5187 = vmatprep.subr.bf16.mxu0 %v5602_v0 }
 0x4a5   :  { %5188 = vmatpush3.bf16.msra.mxu0 %v5532_v46  ;;  %v5542_v46 = vld [vmem:[%s7009_s3 + $0x5d0] sm:$0xff]  }
 0x4a6   :  { %5189 = vmatprep.subr.bf16.mxu0 %v5602_v0 }
 0x4a9   :  { %5190 = vmatpush3.bf16.msra.mxu0 %v5534_v49  ;;  %v5544_v49 = vld [vmem:[%s7009_s3 + $0x5d8] sm:$0xff]  }
 0x4aa   :  { %5191 = vmatprep.subr.bf16.mxu0 %v5602_v0 }
 0x4ad   :  { %5192 = vmatpush3.bf16.msra.mxu0 %v5536_v51  ;;  %v5546_v51 = vld [vmem:[%s7009_s3 + $0x5e0] sm:$0xff]  }
 0x4ae   :  { %5217 = vmatprep.subr.bf16.mxu0 %v5602_v0 }
 0x521   :  { %v2115_v53 = vpop.f32.mrb[32].mxu1 }
 0x522   :  { %v5095_v54 = vpop.f32.mrb[33].mxu1 }
 0x523   :  { %v2118_v55 = vpop.f32.mrb[34].mxu1  ;;  %v2026_v56 = vpop.f32.mrb[32].mxu0  ;;  %v5549_v54 = vld [vmem:[%s7009_s3 + $0x568] sm:$0xff]  }
 0x524   :  { %v2116_v57 = vadd.f32 %v2115_v53, %v2026_v56  ;;  %v5096_v58 = vpop.f32.mrb[35].mxu1  ;;  %v5075_v59 = vpop.f32.mrb[33].mxu0  ;;  %v5548_v53 = vld [vmem:[%s7009_s3 + $0x5e8] sm:$0xff]  }
 0x525   :  { %v2029_v60 = vpop.f32.mrb[34].mxu0  ;;  %v5552_v58 = vld [vmem:[%s7009_s3 + $0x5f8] sm:$0xff]  }
 0x526   :  { %v2119_v61 = vadd.f32 %v2118_v55, %v2029_v60  ;;  %v5076_v62 = vpop.f32.mrb[35].mxu0  ;;  %v5550_v55 = vld [vmem:[%s7009_s3 + $0x5f0] sm:$0xff]  }
 0x541   :  { %v2343_v1 = vpop.f32.mrb[36].mxu1 }
 0x542   :  { %v5135_v2 = vpop.f32.mrb[37].mxu1 }
 0x543   :  { %v2346_v4 = vpop.f32.mrb[38].mxu1  ;;  %v2228_v5 = vpop.f32.mrb[36].mxu0 }
 0x544   :  { %v2235_v6 = vadd.f32 %v2228_v5, %v2116_v57  ;;  %v5136_v30 = vpop.f32.mrb[39].mxu1  ;;  %v5115_v7 = vpop.f32.mrb[37].mxu0  ;;  %v5551_v57 = vld [vmem:[%s7009_s3 + $0x570] sm:$0xff]  }
 0x545   :  { %v2231_v8 = vpop.f32.mrb[38].mxu0  ;;  %v5554_v30 = vld [vmem:[%s7009_s3 + $0x600] sm:$0xff]  }
 0x546   :  { %v2236_v33 = vadd.f32 %v2231_v8, %v2119_v61  ;;  %v5116_v9 = vpop.f32.mrb[39].mxu0  ;;  %v2350_v10 = vadd.f32 %v2343_v1, %v2235_v6  ;;  %v5553_v1 = vld [vmem:[%s7009_s3 + $0x578] sm:$0xff]   ;;  %v5555_v8 = vld [vmem:[%s7009_s3 + $0x608] sm:$0xff]  }
 0x547   :  { %v5557_v9 = vld [vmem:[%s7009_s3 + $0x618] sm:$0xff]  }
 0x548   :  { %v2351_v11 = vadd.f32 %v2346_v4, %v2236_v33  ;;  %v5556_v33 = vld [vmem:[%s7009_s3 + $0x610] sm:$0xff]  }
 0x563   :  { %v2458_v12 = vpop.f32.mrb[40].mxu0 }
 0x564   :  { %v2465_v15 = vadd.f32 %v2458_v12, %v2350_v10  ;;  %v5155_v16 = vpop.f32.mrb[41].mxu0  ;;  %v5558_v10 = vld [vmem:[%s7009_s3 + $0x620] sm:$0xff]   ;;  %v5560_v12 = vld [vmem:[%s7009_s3 + $0x630] sm:$0xff]  }
 0x565   :  { %v2461_v17 = vpop.f32.mrb[42].mxu0  ;;  %v5563_v16 = vld [vmem:[%s7009_s3 + $0x640] sm:$0xff]  }
 0x566   :  { %v2475_v19 = vadd.f32 %v4205_v13, %v2465_v15  ;;  %v2466_v20 = vadd.f32 %v2461_v17, %v2351_v11  ;;  %v5156_v22 = vpop.f32.mrb[43].mxu0  ;;  %v5559_v11 = vld [vmem:[%s7009_s3 + $0x628] sm:$0xff]   ;;  %v5562_v15 = vld [vmem:[%s7009_s3 + $0x6c0] sm:$0xff]  }
 0x567   :  { %v5564_v17 = vld [vmem:[%s7009_s3 + $0x6c8] sm:$0xff]   ;;  %v5567_v22 = vld [vmem:[%s7009_s3 + $0x650] sm:$0xff]  }
 0x568   :  { %v2477_v23 = vmul.f32 0.3, %v2475_v19  ;;  %v2476_v24 = vadd.f32 %v4205_v13, %v2466_v20  ;;  %v5561_v13 = vld [vmem:[%s7009_s3 + $0x638] sm:$0xff]   ;;  %v5565_v19 = vld [vmem:[%s7009_s3 + $0x648] sm:$0xff]   ;;  %v5566_v20 = vld [vmem:[%s7009_s3 + $0x6d0] sm:$0xff]  }
 0x56a   :  { %v6633_v25 = vadd.f32 %v2477_v23, %v6199_v63  ;;  %v2478_v26 = vmul.f32 0.3, %v2476_v24  ;;  %v5568_v23 = vld [vmem:[%s7009_s3 + $0x6d8] sm:$0xff]  }
 0x56b   :  { %v5569_v24 = vld [vmem:[%s7009_s3 + $0x658] sm:$0xff]  }
 0x56c   :  { %v6636_v28 = vmax.f32 %v6633_v25, 0.0  ;;  %v6639_v29 = vadd.f32 %v2478_v26, %v6205_v3  ;;  %v5570_v26 = vld [vmem:[%s7009_s3 + $0x6e0] sm:$0xff]  }
 0x56e   :  { %v6642_v31 = vmax.f32 %v6639_v29, 0.0  ;;  %v2501_v63 = vrot.slane %v6636_v28, 6  ;;  %v2933_v39 = vrot.slane %v6636_v28, 2  ;;  %v2818_v59 = vrot.slane %v6636_v28, 1 }
 0x56f   :  { %v2703_v2 = vrot.slane %v6636_v28, 7 }
 0x570   :  { %v2483_v34 = vpack.c.bf16 %v6642_v31, %v6636_v28  ;;  %v2502_v35 = vrot.slane %v6642_v31, 6  ;;  %v2934_v36 = vrot.slane %v6642_v31, 2  ;;  %v2819_v56 = vrot.slane %v6642_v31, 1  ;;  %v5571_v28 = vld [vmem:[%s7009_s3 + $0x660] sm:$0xff]  }
 0x571   :  { %v2704_v60 = vrot.slane %v6642_v31, 7  ;;  %v5572_v31 = vld [vmem:[%s7009_s3 + $0x6e8] sm:$0xff]  }
 0x572   :  { %5194 = vmatmul.mubr.bf16.vlgmr.msra.gmra.mrb[44].mxu0 %v2483_v34  ;;  %v2503_v3 = vsel %vm185_vm5, %v2501_v63, %v2502_v35  ;;  %v2504_v37 = vsel %vm185_vm5, %v2502_v35, %v2501_v63  ;;  %v6668_v42 = vsel %vm619_vm8, %v2933_v39, %v2934_v36  ;;  %v6672_v43 = vsel %vm619_vm8, %v2934_v36, %v2933_v39  ;;  %v5574_v34 = vld [vmem:[%s7009_s3 + $0x6f0] sm:$0xff]   ;;  %v5576_v35 = vld [vmem:[%s7009_s3 + $0x6f8] sm:$0xff]  }
 0x573   :  { %5218 = vmatpush3.bf16.msra.mxu0 %v5538_v32  ;;  %v4247_v40 = vpack.c.bf16 %v2503_v3, %v2504_v37  ;;  %5233 = vmatprep.mubr.msk.bf16.mxu0 %vm5603_vm0, %v5602_v0  ;;  %v4336_v44 = vpack.c.bf16 %v6672_v43, %v6668_v42  ;;  %v2820_v61 = vsel %vm503_vm10, %v2818_v59, %v2819_v56  ;;  %v5573_v32 = vld [vmem:[%s7009_s3 + $0x668] sm:$0xff]   ;;  %v5575_v63 = vld [vmem:[%s7009_s3 + $0x670] sm:$0xff]   ;;  %v5577_v36 = vld [vmem:[%s7009_s3 + $0x678] sm:$0xff]  }
 0x574   :  { %5219 = vmatprep.subr.bf16.mxu0 %v5602_v0  ;;  %v2821_v62 = vsel %vm503_vm10, %v2819_v56, %v2818_v59  ;;  %v2705_v5 = vsel %vm387_vm13, %v2703_v2, %v2704_v60  ;;  %v2706_v6 = vsel %vm387_vm13, %v2704_v60, %v2703_v2  ;;  %v4339_v60 = vld [vmem:[%s7011_s4 + $0x4] ss:$0 sm:$0xff] }
 0x575   :  { %5174 = vmatmul.mubr.msk.bf16.vlgmr.msra.gmra.mrb[40].mxu1 %vm5771_vm9, %v4247_v40  ;;  %v4309_v4 = vpack.c.bf16 %v2821_v62, %v2820_v61  ;;  %v4282_v7 = vpack.c.bf16 %v2705_v5, %v2706_v6 }
 0x576   :  { %5198 = vmatpush3.bf16.msra.mxu1 %v5539_v38  ;;  %5213 = vmatprep.mubr.msk.bf16.mxu1 %vm5603_vm0, %v5602_v0 }
 0x577   :  { %5220 = vmatpush3.bf16.msra.mxu0 %v5540_v41  ;;  %5199 = vmatprep.subr.bf16.mxu1 %v5602_v0 }
 0x578   :  { %5221 = vmatprep.subr.bf16.mxu0 %v5602_v0 }
 0x57a   :  { %5200 = vmatpush3.bf16.msra.mxu1 %v5541_v45 }
 0x57b   :  { %5222 = vmatpush3.bf16.msra.mxu0 %v5542_v46  ;;  %5201 = vmatprep.subr.bf16.mxu1 %v5602_v0 }
 0x57c   :  { %5223 = vmatprep.subr.bf16.mxu0 %v5602_v0 }
 0x57e   :  { %5202 = vmatpush3.bf16.msra.mxu1 %v5543_v48 }
 0x57f   :  { %5224 = vmatpush3.bf16.msra.mxu0 %v5544_v49  ;;  %5203 = vmatprep.subr.bf16.mxu1 %v5602_v0 }
 0x580   :  { %5225 = vmatprep.subr.bf16.mxu0 %v5602_v0 }
 0x582   :  { %5204 = vmatpush3.bf16.msra.mxu1 %v5545_v50 }
 0x583   :  { %5226 = vmatpush3.bf16.msra.mxu0 %v5546_v51  ;;  %5205 = vmatprep.subr.bf16.mxu1 %v5602_v0 }
 0x584   :  { %5227 = vmatprep.subr.bf16.mxu0 %v5602_v0 }
 0x586   :  { %5206 = vmatpush3.bf16.msra.mxu1 %v5547_v52 }
 0x587   :  { %5228 = vmatpush3.bf16.msra.mxu0 %v5548_v53  ;;  %5207 = vmatprep.subr.bf16.mxu1 %v5602_v0 }
 0x588   :  { %5229 = vmatprep.subr.bf16.mxu0 %v5602_v0 }
 0x58a   :  { %5208 = vmatpush3.bf16.msra.mxu1 %v5549_v54 }
 0x58b   :  { %5230 = vmatpush3.bf16.msra.mxu0 %v5550_v55  ;;  %5209 = vmatprep.subr.bf16.mxu1 %v5602_v0 }
 0x58c   :  { %5231 = vmatprep.subr.bf16.mxu0 %v5602_v0 }
 0x58e   :  { %5210 = vmatpush3.bf16.msra.mxu1 %v5551_v57 }
 0x58f   :  { %5232 = vmatpush3.bf16.msra.mxu0 %v5552_v58  ;;  %5211 = vmatprep.subr.bf16.mxu1 %v5602_v0 }
 0x590   :  { %5257 = vmatprep.subr.bf16.mxu0 %v5602_v0 }
 0x592   :  { %5212 = vmatpush3.bf16.msra.mxu1 %v5553_v1  ;;  %5234 = vmatmul.mubr.msk.bf16.vlgmr.msra.gmra.mrb[48].mxu0 %vm5863_vm14, %v4309_v4 }
 0x593   :  { %5237 = vmatprep.subr.bf16.mxu1 %v5602_v0  ;;  %5273 = vmatprep.mubr.msk.bf16.mxu0 %vm5603_vm0, %v5602_v0 }
 0x594   :  { %5258 = vmatpush3.bf16.msra.mxu0 %v5563_v16 }
 0x595   :  { %5214 = vmatmul.mubr.msk.bf16.vlgmr.msra.gmra.mrb[44].mxu1 %vm5875_vm2, %v4282_v7  ;;  %5259 = vmatprep.subr.bf16.mxu0 %v5602_v0 }
 0x596   :  { %5238 = vmatpush3.bf16.msra.mxu1 %v5554_v30  ;;  %5253 = vmatprep.mubr.msk.bf16.mxu1 %vm5603_vm0, %v5602_v0 }
 0x597   :  { %5239 = vmatprep.subr.bf16.mxu1 %v5602_v0 }
 0x598   :  { %5260 = vmatpush3.bf16.msra.mxu0 %v5565_v19 }
 0x599   :  { %5261 = vmatprep.subr.bf16.mxu0 %v5602_v0 }
 0x59a   :  { %5240 = vmatpush3.bf16.msra.mxu1 %v5555_v8 }
 0x59b   :  { %5241 = vmatprep.subr.bf16.mxu1 %v5602_v0 }
 0x59c   :  { %5262 = vmatpush3.bf16.msra.mxu0 %v5567_v22  ;;  %v5579_v22 = vld [vmem:[%s7009_s3 + $0x680] sm:$0xff]  }
 0x59d   :  { %5263 = vmatprep.subr.bf16.mxu0 %v5602_v0 }
 0x59e   :  { %5242 = vmatpush3.bf16.msra.mxu1 %v5556_v33 }
 0x59f   :  { %5243 = vmatprep.subr.bf16.mxu1 %v5602_v0 }
 0x5a0   :  { %5264 = vmatpush3.bf16.msra.mxu0 %v5569_v24 }
 0x5a1   :  { %5265 = vmatprep.subr.bf16.mxu0 %v5602_v0 }
 0x5a2   :  { %5244 = vmatpush3.bf16.msra.mxu1 %v5557_v9 }
 0x5a3   :  { %5245 = vmatprep.subr.bf16.mxu1 %v5602_v0 }
 0x5a4   :  { %5266 = vmatpush3.bf16.msra.mxu0 %v5571_v28 }
 0x5a5   :  { %5267 = vmatprep.subr.bf16.mxu0 %v5602_v0 }
 0x5a6   :  { %5246 = vmatpush3.bf16.msra.mxu1 %v5558_v10 }
 0x5a7   :  { %5247 = vmatprep.subr.bf16.mxu1 %v5602_v0 }
 0x5a8   :  { %5268 = vmatpush3.bf16.msra.mxu0 %v5573_v32 }
 0x5a9   :  { %5269 = vmatprep.subr.bf16.mxu0 %v5602_v0 }
 0x5aa   :  { %5248 = vmatpush3.bf16.msra.mxu1 %v5559_v11 }
 0x5ab   :  { %5249 = vmatprep.subr.bf16.mxu1 %v5602_v0 }
 0x5ac   :  { %5270 = vmatpush3.bf16.msra.mxu0 %v5575_v63 }
 0x5ad   :  { %5271 = vmatprep.subr.bf16.mxu0 %v5602_v0 }
 0x5ae   :  { %5250 = vmatpush3.bf16.msra.mxu1 %v5560_v12 }
 0x5af   :  { %5251 = vmatprep.subr.bf16.mxu1 %v5602_v0 }
 0x5b0   :  { %5272 = vmatpush3.bf16.msra.mxu0 %v5577_v36 }
 0x5b1   :  { %5297 = vmatprep.subr.bf16.mxu0 %v5602_v0 }
 0x5b2   :  { %5252 = vmatpush3.bf16.msra.mxu1 %v5561_v13  ;;  %v5578_v13 = vld [vmem:[%s7009_s3 + $0x700] sm:$0xff]  }
 0x5b3   :  { %5277 = vmatprep.subr.bf16.mxu1 %v5602_v0 }
 0x5b5   :  { %5254 = vmatmul.mubr.msk.bf16.vlgmr.msra.gmra.mrb[48].mxu1 %vm5737_vm4, %v4336_v44 }
 0x5b6   :  { %5293 = vmatprep.mubr.msk.bf16.mxu1 %vm5603_vm0, %v5602_v0  ;;  %5278 = vmatpush3.bf16.msra.mxu1 %v5562_v15 }
 0x5b7   :  { %5279 = vmatprep.subr.bf16.mxu1 %v5602_v0 }
 0x5ba   :  { %5280 = vmatpush3.bf16.msra.mxu1 %v5564_v17 }
 0x5bb   :  { %5281 = vmatprep.subr.bf16.mxu1 %v5602_v0 }
 0x5be   :  { %5282 = vmatpush3.bf16.msra.mxu1 %v5566_v20 }
 0x5bf   :  { %5283 = vmatprep.subr.bf16.mxu1 %v5602_v0 }
 0x5c2   :  { %5284 = vmatpush3.bf16.msra.mxu1 %v5568_v23 }
 0x5c3   :  { %5285 = vmatprep.subr.bf16.mxu1 %v5602_v0 }
 0x5c6   :  { %5286 = vmatpush3.bf16.msra.mxu1 %v5570_v26 }
 0x5c7   :  { %5287 = vmatprep.subr.bf16.mxu1 %v5602_v0 }
 0x5ca   :  { %5288 = vmatpush3.bf16.msra.mxu1 %v5572_v31 }
 0x5cb   :  { %5289 = vmatprep.subr.bf16.mxu1 %v5602_v0 }
 0x5ce   :  { %5290 = vmatpush3.bf16.msra.mxu1 %v5574_v34  ;;  %v5580_v34 = vld [vmem:[%s7009_s3 + $0x708] sm:$0xff]  }
 0x5cf   :  { %5291 = vmatprep.subr.bf16.mxu1 %v5602_v0 }
 0x5d2   :  { %5292 = vmatpush3.bf16.msra.mxu1 %v5576_v35 }
 0x5d3   :  { %5317 = vmatprep.subr.bf16.mxu1 %v5602_v0 }
 0x645   :  { %v2696_v3 = vpop.f32.mrb[44].mxu0 }
 0x646   :  { %v5195_v37 = vpop.f32.mrb[45].mxu0 }
 0x647   :  { %v2699_v38 = vpop.f32.mrb[46].mxu0  ;;  %v5581_v37 = vld [vmem:[%s7009_s3 + $0x688] sm:$0xff]  }
 0x648   :  { %v2607_v39 = vpop.f32.mrb[40].mxu1  ;;  %v5196_v40 = vpop.f32.mrb[47].mxu0 }
 0x649   :  { %v2697_v41 = vadd.f32 %v2696_v3, %v2607_v39  ;;  %v5175_v42 = vpop.f32.mrb[41].mxu1  ;;  %v5585_v39 = vld [vmem:[%s7009_s3 + $0x698] sm:$0xff]   ;;  %v5586_v40 = vld [vmem:[%s7009_s3 + $0x720] sm:$0xff]  }
 0x64a   :  { %v2610_v43 = vpop.f32.mrb[42].mxu1  ;;  %v5588_v42 = vld [vmem:[%s7009_s3 + $0x728] sm:$0xff]  }
 0x64b   :  { %v2700_v44 = vadd.f32 %v2699_v38, %v2610_v43  ;;  %v5176_v45 = vpop.f32.mrb[43].mxu1  ;;  %v5584_v38 = vld [vmem:[%s7009_s3 + $0x718] sm:$0xff]   ;;  %v5589_v43 = vld [vmem:[%s7009_s3 + $0x6a8] sm:$0xff]  }
 0x64c   :  { %v5591_v45 = vld [vmem:[%s7009_s3 + $0x6b0] sm:$0xff]  }
 0x665   :  { %v2924_v46 = vpop.f32.mrb[48].mxu0 }
 0x666   :  { %v5235_v48 = vpop.f32.mrb[49].mxu0 }
 0x667   :  { %v2927_v49 = vpop.f32.mrb[50].mxu0  ;;  %v5593_v48 = vld [vmem:[%s7009_s3 + $0x6b8] sm:$0xff]  }
 0x668   :  { %v2809_v50 = vpop.f32.mrb[44].mxu1  ;;  %v5236_v51 = vpop.f32.mrb[51].mxu0 }
 0x669   :  { %v2816_v52 = vadd.f32 %v2809_v50, %v2697_v41  ;;  %v5215_v53 = vpop.f32.mrb[45].mxu1  ;;  %v5587_v41 = vld [vmem:[%s7009_s3 + $0x6a0] sm:$0xff]   ;;  %v5595_v50 = vld [vmem:[%s7009_s3 + $0x748] sm:$0xff]  }
 0x66a   :  { %v2812_v54 = vpop.f32.mrb[46].mxu1  ;;  %v5598_v51 = vld [vmem:[%s7009_s3 + $0x760] sm:$0xff]   ;;  %v5600_v53 = vld [vmem:[%s7009_s3 + $0x770] sm:$0xff]  }
 0x66b   :  { %v2817_v55 = vadd.f32 %v2812_v54, %v2700_v44  ;;  %v5216_v56 = vpop.f32.mrb[47].mxu1  ;;  %v2931_v57 = vadd.f32 %v2924_v46, %v2816_v52  ;;  %v5590_v44 = vld [vmem:[%s7009_s3 + $0x730] sm:$0xff]   ;;  %v5592_v46 = vld [vmem:[%s7009_s3 + $0x738] sm:$0xff]   ;;  %v5599_v52 = vld [vmem:[%s7009_s3 + $0x768] sm:$0xff]  }
 0x66c   :  { %v5601_v54 = vld [vmem:[%s7009_s3 + $0x778] sm:$0xff]  }
 0x66d   :  { %v2932_v58 = vadd.f32 %v2927_v49, %v2817_v55  ;;  %v5594_v49 = vld [vmem:[%s7009_s3 + $0x740] sm:$0xff]   ;;  %v12_v55 = vstv %s7012_s6 }
 0x66e   :  { %13 = vst [vmem:[#allocation2] sm:$0x1] %v12_v55 }
 0x688   :  { %v3039_v59 = vpop.f32.mrb[48].mxu1 }
 0x689   :  { %v3046_v61 = vadd.f32 %v3039_v59, %v2931_v57  ;;  %v5255_v62 = vpop.f32.mrb[49].mxu1 }
 0x68a   :  { %v3042_v1 = vpop.f32.mrb[50].mxu1 }
 0x68b   :  { %v3056_v2 = vadd.f32 %v4339_v60, %v3046_v61  ;;  %v3047_v4 = vadd.f32 %v3042_v1, %v2932_v58  ;;  %v5256_v5 = vpop.f32.mrb[51].mxu1 }
 0x68d   :  { %v3058_v6 = vmax.f32 %v3056_v2, 0.0  ;;  %v3057_v30 = vadd.f32 %v4339_v60, %v3047_v4 }
 0x68f   :  { %v3059_v7 = vmax.f32 %v3057_v30, 0.0  ;;  %v3078_v8 = vrot.slane %v3058_v6, 6  ;;  %v3395_v33 = vrot.slane %v3058_v6, 1  ;;  %v3280_v15 = vrot.slane %v3058_v6, 7 }
 0x690   :  { %v3510_v16 = vrot.slane %v3058_v6, 2 }
 0x691   :  { %v3079_v9 = vrot.slane %v3059_v7, 6  ;;  %v3281_v10 = vrot.slane %v3059_v7, 7  ;;  %v3396_v11 = vrot.slane %v3059_v7, 1  ;;  %v3511_v12 = vrot.slane %v3059_v7, 2 }
 0x692   :  { %v3060_v17 = vpack.c.bf16 %v3059_v7, %v3058_v6 }
 0x693   :  { %v3080_v19 = vsel %vm185_vm5, %v3078_v8, %v3079_v9  ;;  %v3081_v20 = vsel %vm185_vm5, %v3079_v9, %v3078_v8  ;;  %v3397_v23 = vsel %vm503_vm10, %v3395_v33, %v3396_v11  ;;  %v3398_v24 = vsel %vm503_vm10, %v3396_v11, %v3395_v33 }
 0x694   :  { %5294 = vmatmul.mubr.bf16.vlgmr.msra.gmra.mrb[52].mxu1 %v3060_v17  ;;  %v4381_v26 = vpack.c.bf16 %v3080_v19, %v3081_v20  ;;  %v4443_v28 = vpack.c.bf16 %v3398_v24, %v3397_v23  ;;  %v3282_v31 = vsel %vm387_vm13, %v3280_v15, %v3281_v10  ;;  %v3283_v32 = vsel %vm387_vm13, %v3281_v10, %v3280_v15  ;;  %v4473_v15 = vld [vmem:[%s7011_s4 + $0x5] ss:$0 sm:$0xff] }
 0x695   :  { %5318 = vmatpush3.bf16.msra.mxu1 %v5578_v13  ;;  %5333 = vmatprep.mubr.msk.bf16.mxu1 %vm5603_vm0, %v5602_v0  ;;  %v4416_v63 = vpack.c.bf16 %v3282_v31, %v3283_v32  ;;  %v6885_v35 = vsel %vm619_vm8, %v3510_v16, %v3511_v12  ;;  %v6889_v36 = vsel %vm619_vm8, %v3511_v12, %v3510_v16 }
 0x696   :  { %5274 = vmatmul.mubr.msk.bf16.vlgmr.msra.gmra.mrb[52].mxu0 %vm5771_vm9, %v4381_v26  ;;  %5319 = vmatprep.subr.bf16.mxu1 %v5602_v0  ;;  %v4470_v3 = vpack.c.bf16 %v6889_v36, %v6885_v35 }
 0x697   :  { %5298 = vmatpush3.bf16.msra.mxu0 %v5579_v22  ;;  %5313 = vmatprep.mubr.msk.bf16.mxu0 %vm5603_vm0, %v5602_v0 }
 0x698   :  { %5299 = vmatprep.subr.bf16.mxu0 %v5602_v0 }
 0x699   :  { %5320 = vmatpush3.bf16.msra.mxu1 %v5580_v34 }
 0x69a   :  { %5321 = vmatprep.subr.bf16.mxu1 %v5602_v0 }
 0x69b   :  { %5300 = vmatpush3.bf16.msra.mxu0 %v5581_v37 }
 0x69c   :  { %5301 = vmatprep.subr.bf16.mxu0 %v5602_v0 }
 0x69d   :  { %5322 = vmatpush3.bf16.msra.mxu1 %v5582_v21 }
 0x69e   :  { %5323 = vmatprep.subr.bf16.mxu1 %v5602_v0 }
 0x69f   :  { %5302 = vmatpush3.bf16.msra.mxu0 %v5583_v47 }
 0x6a0   :  { %5303 = vmatprep.subr.bf16.mxu0 %v5602_v0 }
 0x6a1   :  { %5324 = vmatpush3.bf16.msra.mxu1 %v5584_v38 }
 0x6a2   :  { %5325 = vmatprep.subr.bf16.mxu1 %v5602_v0 }
 0x6a3   :  { %5304 = vmatpush3.bf16.msra.mxu0 %v5585_v39 }
 0x6a4   :  { %5305 = vmatprep.subr.bf16.mxu0 %v5602_v0 }
 0x6a5   :  { %5326 = vmatpush3.bf16.msra.mxu1 %v5586_v40 }
 0x6a6   :  { %5327 = vmatprep.subr.bf16.mxu1 %v5602_v0 }
 0x6a7   :  { %5306 = vmatpush3.bf16.msra.mxu0 %v5587_v41 }
 0x6a8   :  { %5307 = vmatprep.subr.bf16.mxu0 %v5602_v0 }
 0x6a9   :  { %5328 = vmatpush3.bf16.msra.mxu1 %v5588_v42 }
 0x6aa   :  { %5329 = vmatprep.subr.bf16.mxu1 %v5602_v0 }
 0x6ab   :  { %5308 = vmatpush3.bf16.msra.mxu0 %v5589_v43 }
 0x6ac   :  { %5309 = vmatprep.subr.bf16.mxu0 %v5602_v0 }
 0x6ad   :  { %5330 = vmatpush3.bf16.msra.mxu1 %v5590_v44 }
 0x6ae   :  { %5331 = vmatprep.subr.bf16.mxu1 %v5602_v0 }
 0x6af   :  { %5310 = vmatpush3.bf16.msra.mxu0 %v5591_v45 }
 0x6b0   :  { %5311 = vmatprep.subr.bf16.mxu0 %v5602_v0 }
 0x6b1   :  { %5332 = vmatpush3.bf16.msra.mxu1 %v5592_v46  ;;  %v4475_v46 = vld [vmem:[#allocation2] ss:$0 sm:$0xff] }
 0x6b3   :  { %5312 = vmatpush3.bf16.msra.mxu0 %v5593_v48 }
 0x6b4   :  { %5334 = vmatmul.mubr.msk.bf16.vlgmr.msra.gmra.mrb[56].mxu1 %vm5863_vm14, %v4443_v28  ;;  %5337 = vmatprep.subr.bf16.mxu0 %v5602_v0 }
 0x6b6   :  { %5314 = vmatmul.mubr.msk.bf16.vlgmr.msra.gmra.mrb[56].mxu0 %vm5875_vm2, %v4416_v63 }
 0x6b7   :  { %5338 = vmatpush3.bf16.msra.mxu0 %v5594_v49  ;;  %5353 = vmatprep.mubr.msk.bf16.mxu0 %vm5603_vm0, %v5602_v0  ;;  %vm3654_vm0 = vcmask 1040384  }
 0x6b8   :  { %5339 = vmatprep.subr.bf16.mxu0 %v5602_v0 }
 0x6bb   :  { %5340 = vmatpush3.bf16.msra.mxu0 %v5595_v50 }
 0x6bc   :  { %5341 = vmatprep.subr.bf16.mxu0 %v5602_v0 }
 0x6bf   :  { %5342 = vmatpush3.bf16.msra.mxu0 %v5596_v14 }
 0x6c0   :  { %5343 = vmatprep.subr.bf16.mxu0 %v5602_v0 }
 0x6c3   :  { %5344 = vmatpush3.bf16.msra.mxu0 %v5597_v18 }
 0x6c4   :  { %5345 = vmatprep.subr.bf16.mxu0 %v5602_v0 }
 0x6c7   :  { %5346 = vmatpush3.bf16.msra.mxu0 %v5598_v51 }
 0x6c8   :  { %5347 = vmatprep.subr.bf16.mxu0 %v5602_v0 }
 0x6cb   :  { %5348 = vmatpush3.bf16.msra.mxu0 %v5599_v52 }
 0x6cc   :  { %5349 = vmatprep.subr.bf16.mxu0 %v5602_v0 }
 0x6cf   :  { %5350 = vmatpush3.bf16.msra.mxu0 %v5600_v53 }
 0x6d0   :  { %5351 = vmatprep.subr.bf16.mxu0 %v5602_v0 }
 0x6d3   :  { %5352 = vmatpush3.bf16.msra.mxu0 %v5601_v54 }
 0x6d6   :  { %5354 = vmatmul.mubr.msk.bf16.vlgmr.msra.gmra.mrb[60].mxu0 %vm5737_vm4, %v4470_v3  ;;  %vm3676_vm4 = vcmask 1024  }
 0x767   :  { %v3273_v56 = vpop.f32.mrb[52].mxu1 }
 0x768   :  { %v5295_v57 = vpop.f32.mrb[53].mxu1 }
 0x769   :  { %v3276_v58 = vpop.f32.mrb[54].mxu1  ;;  %v3184_v59 = vpop.f32.mrb[52].mxu0 }
 0x76a   :  { %v3274_v60 = vadd.f32 %v3273_v56, %v3184_v59  ;;  %v5296_v61 = vpop.f32.mrb[55].mxu1  ;;  %v5275_v62 = vpop.f32.mrb[53].mxu0 }
 0x76b   :  { %v3187_v0 = vpop.f32.mrb[54].mxu0 }
 0x76c   :  { %v3277_v1 = vadd.f32 %v3276_v58, %v3187_v0  ;;  %v5276_v2 = vpop.f32.mrb[55].mxu0 }
 0x787   :  { %v3501_v4 = vpop.f32.mrb[56].mxu1 }
 0x788   :  { %v5335_v5 = vpop.f32.mrb[57].mxu1 }
 0x789   :  { %v3504_v6 = vpop.f32.mrb[58].mxu1  ;;  %v3386_v27 = vpop.f32.mrb[56].mxu0 }
 0x78a   :  { %v3393_v30 = vadd.f32 %v3386_v27, %v3274_v60  ;;  %v5336_v7 = vpop.f32.mrb[59].mxu1  ;;  %v5315_v8 = vpop.f32.mrb[57].mxu0 }
 0x78b   :  { %v3389_v33 = vpop.f32.mrb[58].mxu0 }
 0x78c   :  { %v3394_v9 = vadd.f32 %v3389_v33, %v3277_v1  ;;  %v5316_v10 = vpop.f32.mrb[59].mxu0  ;;  %v3508_v11 = vadd.f32 %v3501_v4, %v3393_v30 }
 0x78e   :  { %v3509_v12 = vadd.f32 %v3504_v6, %v3394_v9 }
 0x7a9   :  { %v3616_v13 = vpop.f32.mrb[60].mxu0 }
 0x7aa   :  { %v3623_v16 = vadd.f32 %v3616_v13, %v3508_v11  ;;  %v5355_v17 = vpop.f32.mrb[61].mxu0 }
 0x7ab   :  { %v3619_v19 = vpop.f32.mrb[62].mxu0 }
 0x7ac   :  { %v3633_v20 = vadd.f32 %v4473_v15, %v3623_v16  ;;  %v3624_v22 = vadd.f32 %v3619_v19, %v3509_v12  ;;  %v5356_v23 = vpop.f32.mrb[63].mxu0 }
 0x7ae   :  { %v3635_v24 = vmul.f32 0.3, %v3633_v20  ;;  %v3634_v26 = vadd.f32 %v4473_v15, %v3624_v22 }
 0x7b0   :  { %v3637_v28 = vadd.f32 %v3635_v24, %v6633_v25  ;;  %v3636_v31 = vmul.f32 0.3, %v3634_v26  ;;  %v4474_v25 = vld [vmem:[%s7013_s5] ss:$0 sm:$0xff] }
 0x7b2   :  { %v3639_v32 = vrot.slane %v3637_v28, 4  ;;  %v3638_v34 = vadd.f32 %v3636_v31, %v6639_v29 }
 0x7b4   :  { %v3640_v63 = vadd.f32 %v3639_v32, %v3637_v28  ;;  %v3647_v35 = vrot.slane %v3638_v34, 4 }
 0x7b6   :  { %v3641_v36 = vrot.slane %v3640_v63, 2  ;;  %v3648_v3 = vadd.f32 %v3647_v35, %v3638_v34 }
 0x7b8   :  { %v3642_v37 = vadd.f32 %v3641_v36, %v3640_v63  ;;  %v3649_v21 = vrot.slane %v3648_v3, 2 }
 0x7ba   :  { %v3650_v47 = vadd.f32 %v3649_v21, %v3648_v3  ;;  %v3643_v38 = vrot.slane %v3642_v37, 1 }
 0x7bc   :  { %v3644_v39 = vadd.f32 %v3643_v38, %v3642_v37  ;;  %v3651_v40 = vrot.slane %v3650_v47, 1 }
 0x7be   :  { %v3652_v41 = vadd.f32 %v3651_v40, %v3650_v47  ;;  %v3646_v42 = vmul.f32 0.125, %v3644_v39 }
 0x7c0   :  { %v3653_v43 = vmul.f32 0.125, %v3652_v41 }
 0x7c2   :  { %v3655_v44 = vsel %vm3654_vm0, %v3646_v42, %v3653_v43 }
 0x7c3   :  { %v3663_v29 = vmul.f32 %v4474_v25, %v3655_v44 }
 0x7c5   :  { %v3665_v45 = vsel %vm3664_vm3, %v3663_v29, 0.0 }
 0x7c6   :  { %3666 = vadd.xlane.f32.xlu0 %v3665_v45 }
 0x853   :  { %v3667_v48 = vpop.xlane.xlu0 %3666 }
 0x854   :  { %v3675_v49 = vadd.f32 %v4475_v46, %v3667_v48 }
 0x856   :  { %3677 = vst.msk [vmem:[%s7014_s7] sm:$0x3] %vm3676_vm4, %v3675_v49 }

</bundles_post_ra>
